<compile_context>
chip_gen: v6e
topology: v6e:2x2x1
jax: 0.10.0
libtpu: 0.0.40
codegen_flags: <defaults>
</compile_context>

<pallas_src>
import functools

import jax
import jax.numpy as jnp
from jax import lax
from jax.experimental import pallas as pl
from jax.experimental.pallas import tpu as pltpu

NEG_SLOPE = 0.2


def _ceil_to(x, m):
    return ((x + m - 1) // m) * m


def _pick_tile(total, cap):
    """Largest multiple-of-128 divisor of `total` (itself a multiple of 128) <= cap."""
    t = min(cap, total)
    while total % t:
        t -= 128
    return t


def _num_tensorcores():
    # v7x has 2 TensorCores sharded over "parallel" grid axes; v5e/v6e have 1.
    try:
        kind = jax.devices()[0].device_kind.lower()
    except Exception:
        return 1
    return 2 if "v7" in kind else 1


_NUM_CORES = _num_tensorcores()


def _choose_m_tile(M, n_tiles, cap=512):
    tile_m = min(cap, _ceil_to(M, 8))
    # Keep both v7x TensorCores fed: guarantee >= 2 blocks on the parallel axes.
    if _NUM_CORES >= 2 and (_ceil_to(M, tile_m) // tile_m) * n_tiles < 2 and tile_m >= 16:
        tile_m = _ceil_to(max(tile_m // 2, 8), 8)
    m_pad = _ceil_to(M, tile_m)
    return tile_m, m_pad


def _vmem_limit(block_bytes):
    est = 2 * block_bytes + (4 << 20)               # double buffering + headroom
    return int(min(max(est, 32 << 20), 48 << 20))   # <= 48 MiB keeps v7x happy


def _patches_spec(block_shape, index_map, extra_buffering):
    if extra_buffering:
        try:  # 3-deep pipelining hides the per-tile patch DMA on long M grids.
            return pl.BlockSpec(block_shape, index_map, pipeline_mode=pl.Buffered(3))
        except Exception:
            pass
    return pl.BlockSpec(block_shape, index_map)


# ----------------------------------------------------------------------------
# Pallas kernels
# ----------------------------------------------------------------------------
def _conv_mm_kernel(p_ref, w_ref, b_ref, o_ref, *, apply_lrelu):
    """One (TILE_M, TILE_N) output tile: bf16 matmul + bias [+ leaky_relu]."""
    y = jnp.dot(p_ref[...], w_ref[...], preferred_element_type=jnp.float32)
    y = y + b_ref[...]
    if apply_lrelu:
        y = jnp.maximum(y, y * NEG_SLOPE)
    o_ref[...] = y.astype(o_ref.dtype)


def _conv_mm_head_kernel(p_ref, w3_ref, b3_ref, w4_ref, b4_ref, o_ref):
    """c3 tile (full 256-wide) + bias + leaky_relu, then fused 1x1 c4 epilogue."""
    h = jnp.dot(p_ref[...], w3_ref[...], preferred_element_type=jnp.float32)
    h = h + b3_ref[...]
    h = jnp.maximum(h, h * NEG_SLOPE)                # leaky_relu(0.2) on c3
    y = jnp.dot(h.astype(w4_ref.dtype), w4_ref[...],
                preferred_element_type=jnp.float32)
    o_ref[...] = (y + b4_ref[...]).astype(o_ref.dtype)


# ----------------------------------------------------------------------------
# pallas_call wrappers
# ----------------------------------------------------------------------------
def conv_matmul(patches, w_mat, bias, *, apply_lrelu, out_dtype):
    """patches [M,K] bf16, w_mat [K,Cout] f32, bias [Cout] -> [M,Cout] out_dtype."""
    M, K = patches.shape
    Cout = w_mat.shape[1]

    c_pad = _ceil_to(Cout, 128)
    tile_n = _pick_tile(c_pad, 256)
    n_tiles = c_pad // tile_n
    tile_m, m_pad = _choose_m_tile(M, n_tiles)
    m_tiles = m_pad // tile_m

    # Patches stay bf16 with their native K (full-dim block; no 128-pad in HBM).
    p = patches.astype(jnp.bfloat16)
    if m_pad != M:
        p = jnp.pad(p, ((0, m_pad - M), (0, 0)))
    w = jnp.pad(w_mat, ((0, 0), (0, c_pad - Cout))).astype(jnp.bfloat16)
    b = jnp.pad(bias, (0, c_pad - Cout)).reshape(1, c_pad).astype(jnp.float32)

    out_bytes = jnp.dtype(out_dtype).itemsize
    block_bytes = (tile_m * K * 2 + K * tile_n * 2 + tile_n * 4
                   + tile_m * tile_n * out_bytes)
    ce = pl.CostEstimate(
        flops=2 * m_pad * K * c_pad,
        transcendentals=0,
        bytes_accessed=p.size * 2 + w.size * 2 + b.size * 4 + m_pad * c_pad * out_bytes,
    )

    out = pl.pallas_call(
        functools.partial(_conv_mm_kernel, apply_lrelu=apply_lrelu),
        out_shape=jax.ShapeDtypeStruct((m_pad, c_pad), out_dtype),
        grid_spec=pltpu.PrefetchScalarGridSpec(
            num_scalar_prefetch=0,
            grid=(m_tiles, n_tiles),
            in_specs=[
                _patches_spec((tile_m, K), lambda i, j: (i, 0), m_tiles >= 3),
                pl.BlockSpec((K, tile_n), lambda i, j: (0, j)),
                pl.BlockSpec((1, tile_n), lambda i, j: (0, j)),
            ],
            out_specs=pl.BlockSpec((tile_m, tile_n), lambda i, j: (i, j)),
        ),
        compiler_params=pltpu.CompilerParams(
            dimension_semantics=("parallel", "parallel"),
            vmem_limit_bytes=_vmem_limit(block_bytes),
        ),
        cost_estimate=ce,
    )(p, w, b)
    return out[:M, :Cout]


def conv_matmul_head(patches, w3_mat, b3, w4_mat, b4):
    """Fused c3 (matmul+bias+leaky_relu) and 1x1 c4 (matmul+bias): [M,K3] -> [M,1]."""
    M, K = patches.shape
    C3 = w3_mat.shape[1]       # 256, un-tiled so the fused c4 epilogue sees full rows
    C4 = w4_mat.shape[1]       # 1
    c4_pad = 128               # lane-dense output store

    tile_m, m_pad = _choose_m_tile(M, 1)
    m_tiles = m_pad // tile_m

    p = patches.astype(jnp.bfloat16)
    if m_pad != M:
        p = jnp.pad(p, ((0, m_pad - M), (0, 0)))
    w3 = w3_mat.astype(jnp.bfloat16)
    b3r = b3.reshape(1, C3).astype(jnp.float32)
    w4 = jnp.pad(w4_mat, ((0, 0), (0, c4_pad - C4))).astype(jnp.bfloat16)
    b4r = jnp.pad(b4, (0, c4_pad - C4)).reshape(1, c4_pad).astype(jnp.float32)

    block_bytes = (tile_m * K * 2 + K * C3 * 2 + C3 * 4 + C3 * c4_pad * 2
                   + c4_pad * 4 + tile_m * c4_pad * 4 + tile_m * C3 * 4)
    ce = pl.CostEstimate(
        flops=2 * m_pad * K * C3 + 2 * m_pad * C3 * c4_pad,
        transcendentals=0,
        bytes_accessed=p.size * 2 + w3.size * 2 + w4.size * 2
        + b3r.size * 4 + b4r.size * 4 + m_pad * c4_pad * 4,
    )

    out = pl.pallas_call(
        _conv_mm_head_kernel,
        out_shape=jax.ShapeDtypeStruct((m_pad, c4_pad), jnp.float32),
        grid_spec=pltpu.PrefetchScalarGridSpec(
            num_scalar_prefetch=0,
            grid=(m_tiles,),
            in_specs=[
                _patches_spec((tile_m, K), lambda i: (i, 0), m_tiles >= 3),
                pl.BlockSpec((K, C3), lambda i: (0, 0)),
                pl.BlockSpec((1, C3), lambda i: (0, 0)),
                pl.BlockSpec((C3, c4_pad), lambda i: (0, 0)),
                pl.BlockSpec((1, c4_pad), lambda i: (0, 0)),
            ],
            out_specs=pl.BlockSpec((tile_m, c4_pad), lambda i: (i, 0)),
        ),
        compiler_params=pltpu.CompilerParams(
            dimension_semantics=("parallel",),
            vmem_limit_bytes=_vmem_limit(block_bytes),
        ),
        cost_estimate=ce,
    )(p, w3, b3r, w4, b4r)
    return out[:M, :C4]


# ----------------------------------------------------------------------------
# Host-side glue: bf16 patch extraction, spectral norm (all under the same jit)
# ----------------------------------------------------------------------------
def extract_patches_nhwc(x_bf16, kh, kw, stride):
    """x: [N,H,W,C] bf16 -> patches [N*Ho*Wo, C*kh*kw] bf16 (K ordered (C, kh, kw))."""
    patches = lax.conv_general_dilated_patches(
        x_bf16,
        filter_shape=(kh, kw),
        window_strides=(stride, stride),
        padding="VALID",
        dimension_numbers=("NHWC", "HWIO", "NHWC"),
    )
    N, Ho, Wo, Kdim = patches.shape
    return patches.reshape(N * Ho * Wo, Kdim), N, Ho, Wo


def spectral_normalize(w, u, eps=1e-4, n_power_iterations=1):
    """PyTorch spectral_norm (eval-mode) semantics: W / sigma via power iteration."""
    # TODO(synk): training-mode in-place update of the `u` buffer is not modeled.
    cout = w.shape[0]
    w_mat = w.reshape(cout, -1)                      # (Cout, K)

    def _normalize(v):
        return v / jnp.maximum(jnp.linalg.norm(v), eps)

    v = None
    for _ in range(n_power_iterations):
        v = _normalize(w_mat.T @ u)
        u = _normalize(w_mat @ v)
    sigma = u @ (w_mat @ v)
    return w / sigma


def conv2d_sn_lrelu(x_nhwc_bf16, w_oihw, b, u, stride):
    """Spectral-norm valid conv + fused leaky_relu(0.2); bf16 in, bf16 out (NHWC)."""
    w_sn = spectral_normalize(w_oihw, u, eps=1e-4)
    cout, cin, kh, kw = w_sn.shape
    patches, N, Ho, Wo = extract_patches_nhwc(x_nhwc_bf16, kh, kw, stride)
    w_mat = w_sn.reshape(cout, cin * kh * kw).T      # K ordered (cin, kh, kw)
    y = conv_matmul(patches, w_mat, b, apply_lrelu=True, out_dtype=jnp.bfloat16)
    return y.reshape(N, Ho, Wo, cout)


# ----------------------------------------------------------------------------
# Model: SSRTVD_D_T (2D mode)
# ----------------------------------------------------------------------------
def init_params(key):
    def conv_init(key, cout, cin, k):
        kw_, kb_, ku_ = jax.random.split(key, 3)
        fan_in = cin * k * k
        w = jax.random.normal(kw_, (cout, cin, k, k), jnp.float32) / jnp.sqrt(fan_in)
        b = jax.random.normal(kb_, (cout,), jnp.float32) * 0.01
        u = jax.random.normal(ku_, (cout,), jnp.float32)
        u = u / jnp.maximum(jnp.linalg.norm(u), 1e-4)
        return {"w": w, "b": b, "u": u}

    k1, k2, k3, k4 = jax.random.split(key, 4)
    return {
        "c1": conv_init(k1, 64, 3, 4),
        "c2": conv_init(k2, 128, 64, 4),
        "c3": conv_init(k3, 256, 128, 4),
        "c4": conv_init(k4, 1, 256, 1),
    }


def ssrtvd_d_t_forward(params, x_nchw):
    """x_nchw: [N,3,H,W] f32 -> [N,1,H',W'] f32 (valid convs, strides 2,2,2,1)."""
    x = jnp.transpose(x_nchw, (0, 2, 3, 1)).astype(jnp.bfloat16)   # NCHW -> NHWC, bf16

    # c1, c2: spectral-norm conv + leaky_relu(0.2), fused in the Pallas kernel.
    for name in ("c1", "c2"):
        p = params[name]
        x = conv2d_sn_lrelu(x, p["w"], p["b"], p["u"], stride=2)

    # c3 (spectral-norm conv + leaky_relu) fused with c4 (plain 1x1 conv).
    p3, p4 = params["c3"], params["c4"]
    w3_sn = spectral_normalize(p3["w"], p3["u"], eps=1e-4)
    cout3, cin3, kh3, kw3 = w3_sn.shape
    patches3, N, Ho, Wo = extract_patches_nhwc(x, kh3, kw3, 2)
    w3_mat = w3_sn.reshape(cout3, cin3 * kh3 * kw3).T               # (K, 256)
    w4_mat = p4["w"].reshape(p4["w"].shape[0], -1).T                # (256, 1)
    y = conv_matmul_head(patches3, w3_mat, p3["b"], w4_mat, p4["b"])
    y = y.reshape(N, Ho, Wo, 1)

    return jnp.transpose(y, (0, 3, 1, 2))                           # NHWC -> NCHW


if __name__ == "__main__":
    key = jax.random.PRNGKey(0)
    pkey, xkey = jax.random.split(key)
    params = init_params(pkey)

    # Small input consistent with the module: batch=2, 3 channels, 32x32 spatial
    # (three stride-2 4x4 valid convs need >= 32 to leave spatial extent).
    x = jax.random.normal(xkey, (2, 3, 32, 32), jnp.float32)

    fwd = jax.jit(ssrtvd_d_t_forward)
    out = fwd(params, x)
    jax.block_until_ready(out)

    assert out.shape == (2, 1, 2, 2), out.shape
    print("KERNEL_OK")
</pallas_src>

<mosaic_0001>
module attributes {stable_mosaic.version = 11 : i64} {
  func.func @_conv_mm_kernel(%arg0: i32, %arg1: i32, %arg2: memref<456x48xbf16, #tpu.memory_space<vmem>>, %arg3: memref<48x128xbf16, #tpu.memory_space<vmem>>, %arg4: memref<1x128xf32, #tpu.memory_space<vmem>>, %arg5: memref<456x128xbf16, #tpu.memory_space<vmem>>) attributes {dimension_semantics = [#tpu.dimension_semantics<parallel>, #tpu.dimension_semantics<parallel>], iteration_bounds = array<i64: 1, 1>, scalar_prefetch = 0 : i64, scratch_operands = 0 : i64, tpu.core_type = #tpu.core_type<tc>, window_params = [{transform_indices = @transform_0, window_bounds = array<i64: 456, 48>}, {transform_indices = @transform_1, window_bounds = array<i64: 48, 128>}, {transform_indices = @transform_2, window_bounds = array<i64: 1, 128>}, {transform_indices = @transform_3, window_bounds = array<i64: 456, 128>}]} {
    %c0 = arith.constant 0 : index
    %c0_0 = arith.constant 0 : index
    %0 = vector.load %arg2[%c0, %c0_0] : memref<456x48xbf16, #tpu.memory_space<vmem>>, vector<456x48xbf16>
    %c0_1 = arith.constant 0 : index
    %c0_2 = arith.constant 0 : index
    %1 = vector.load %arg3[%c0_1, %c0_2] : memref<48x128xbf16, #tpu.memory_space<vmem>>, vector<48x128xbf16>
    %cst = arith.constant dense<0.000000e+00> : vector<456x128xf32>
    %2 = tpu.matmul %0, %1, %cst {dimension_numbers = #tpu.dot_dimension_numbers<[1], [0], [0], [1], [0, 0, 1, 1], [], []>} : vector<456x48xbf16>, vector<48x128xbf16>, vector<456x128xf32> -> vector<456x128xf32>
    %c0_3 = arith.constant 0 : index
    %c0_4 = arith.constant 0 : index
    %3 = vector.load %arg4[%c0_3, %c0_4] : memref<1x128xf32, #tpu.memory_space<vmem>>, vector<1x128xf32>
    %4 = vector.broadcast %3 : vector<1x128xf32> to vector<456x128xf32>
    %5 = arith.addf %2, %4 : vector<456x128xf32>
    %cst_5 = arith.constant 2.000000e-01 : f32
    %6 = vector.broadcast %cst_5 : f32 to vector<456x128xf32>
    %7 = arith.mulf %5, %6 : vector<456x128xf32>
    %8 = arith.maximumf %5, %7 : vector<456x128xf32>
    %9 = arith.truncf %8 : vector<456x128xf32> to vector<456x128xbf16>
    %c0_6 = arith.constant 0 : index
    %c0_7 = arith.constant 0 : index
    %10 = vector.load %arg5[%c0_6, %c0_7] : memref<456x128xbf16, #tpu.memory_space<vmem>>, vector<456x128xbf16>
    tpu.vector_store %arg5[%c0_6, %c0_7], %9 {strides = array<i32>} : memref<456x128xbf16, #tpu.memory_space<vmem>>, vector<456x128xbf16>,
    return
  }
  func.func @transform_0(%arg0: i32, %arg1: i32) -> (i32, i32) {
    %c0_i32 = arith.constant 0 : i32
    %c0_i32_0 = arith.constant 0 : i32
    return %arg0, %c0_i32 : i32, i32
  }
  func.func @transform_1(%arg0: i32, %arg1: i32) -> (i32, i32) {
    %c0_i32 = arith.constant 0 : i32
    %c0_i32_0 = arith.constant 0 : i32
    return %c0_i32, %arg1 : i32, i32
  }
  func.func @transform_2(%arg0: i32, %arg1: i32) -> (i32, i32) {
    %c0_i32 = arith.constant 0 : i32
    %c0_i32_0 = arith.constant 0 : i32
    return %c0_i32, %arg1 : i32, i32
  }
  func.func @transform_3(%arg0: i32, %arg1: i32) -> (i32, i32) {
    %c0_i32 = arith.constant 0 : i32
    return %arg0, %arg1 : i32, i32
  }
}

module attributes {stable_mosaic.version = 11 : i64} {
  func.func @_conv_mm_kernel(%arg0: i32, %arg1: i32, %arg2: memref<72x1024xbf16, #tpu.memory_space<vmem>>, %arg3: memref<1024x128xbf16, #tpu.memory_space<vmem>>, %arg4: memref<1x128xf32, #tpu.memory_space<vmem>>, %arg5: memref<72x128xbf16, #tpu.memory_space<vmem>>) attributes {dimension_semantics = [#tpu.dimension_semantics<parallel>, #tpu.dimension_semantics<parallel>], iteration_bounds = array<i64: 1, 1>, scalar_prefetch = 0 : i64, scratch_operands = 0 : i64, tpu.core_type = #tpu.core_type<tc>, window_params = [{transform_indices = @transform_0, window_bounds = array<i64: 72, 1024>}, {transform_indices = @transform_1, window_bounds = array<i64: 1024, 128>}, {transform_indices = @transform_2, window_bounds = array<i64: 1, 128>}, {transform_indices = @transform_3, window_bounds = array<i64: 72, 128>}]} {
    %c0 = arith.constant 0 : index
    %c0_0 = arith.constant 0 : index
    %0 = vector.load %arg2[%c0, %c0_0] : memref<72x1024xbf16, #tpu.memory_space<vmem>>, vector<72x1024xbf16>
    %c0_1 = arith.constant 0 : index
    %c0_2 = arith.constant 0 : index
    %1 = vector.load %arg3[%c0_1, %c0_2] : memref<1024x128xbf16, #tpu.memory_space<vmem>>, vector<1024x128xbf16>
    %cst = arith.constant dense<0.000000e+00> : vector<72x128xf32>
    %2 = tpu.matmul %0, %1, %cst {dimension_numbers = #tpu.dot_dimension_numbers<[1], [0], [0], [1], [0, 0, 1, 1], [], []>} : vector<72x1024xbf16>, vector<1024x128xbf16>, vector<72x128xf32> -> vector<72x128xf32>
    %c0_3 = arith.constant 0 : index
    %c0_4 = arith.constant 0 : index
    %3 = vector.load %arg4[%c0_3, %c0_4] : memref<1x128xf32, #tpu.memory_space<vmem>>, vector<1x128xf32>
    %4 = vector.broadcast %3 : vector<1x128xf32> to vector<72x128xf32>
    %5 = arith.addf %2, %4 : vector<72x128xf32>
    %cst_5 = arith.constant 2.000000e-01 : f32
    %6 = vector.broadcast %cst_5 : f32 to vector<72x128xf32>
    %7 = arith.mulf %5, %6 : vector<72x128xf32>
    %8 = arith.maximumf %5, %7 : vector<72x128xf32>
    %9 = arith.truncf %8 : vector<72x128xf32> to vector<72x128xbf16>
    %c0_6 = arith.constant 0 : index
    %c0_7 = arith.constant 0 : index
    %10 = vector.load %arg5[%c0_6, %c0_7] : memref<72x128xbf16, #tpu.memory_space<vmem>>, vector<72x128xbf16>
    tpu.vector_store %arg5[%c0_6, %c0_7], %9 {strides = array<i32>} : memref<72x128xbf16, #tpu.memory_space<vmem>>, vector<72x128xbf16>,
    return
  }
  func.func @transform_0(%arg0: i32, %arg1: i32) -> (i32, i32) {
    %c0_i32 = arith.constant 0 : i32
    %c0_i32_0 = arith.constant 0 : i32
    return %arg0, %c0_i32 : i32, i32
  }
  func.func @transform_1(%arg0: i32, %arg1: i32) -> (i32, i32) {
    %c0_i32 = arith.constant 0 : i32
    %c0_i32_0 = arith.constant 0 : i32
    return %c0_i32, %arg1 : i32, i32
  }
  func.func @transform_2(%arg0: i32, %arg1: i32) -> (i32, i32) {
    %c0_i32 = arith.constant 0 : i32
    %c0_i32_0 = arith.constant 0 : i32
    return %c0_i32, %arg1 : i32, i32
  }
  func.func @transform_3(%arg0: i32, %arg1: i32) -> (i32, i32) {
    %c0_i32 = arith.constant 0 : i32
    return %arg0, %arg1 : i32, i32
  }
}

module attributes {stable_mosaic.version = 11 : i64} {
  func.func @_conv_mm_head_kernel(%arg0: i32, %arg1: memref<8x2048xbf16, #tpu.memory_space<vmem>>, %arg2: memref<2048x256xbf16, #tpu.memory_space<vmem>>, %arg3: memref<1x256xf32, #tpu.memory_space<vmem>>, %arg4: memref<256x128xbf16, #tpu.memory_space<vmem>>, %arg5: memref<1x128xf32, #tpu.memory_space<vmem>>, %arg6: memref<8x128xf32, #tpu.memory_space<vmem>>) attributes {dimension_semantics = [#tpu.dimension_semantics<parallel>], iteration_bounds = array<i64: 1>, scalar_prefetch = 0 : i64, scratch_operands = 0 : i64, tpu.core_type = #tpu.core_type<tc>, window_params = [{transform_indices = @transform_0, window_bounds = array<i64: 8, 2048>}, {pipeline_mode = #tpu.pipeline_mode<synchronous>, transform_indices = @transform_1, window_bounds = array<i64: 2048, 256>}, {pipeline_mode = #tpu.pipeline_mode<synchronous>, transform_indices = @transform_2, window_bounds = array<i64: 1, 256>}, {pipeline_mode = #tpu.pipeline_mode<synchronous>, transform_indices = @transform_3, window_bounds = array<i64: 256, 128>}, {pipeline_mode = #tpu.pipeline_mode<synchronous>, transform_indices = @transform_4, window_bounds = array<i64: 1, 128>}, {transform_indices = @transform_5, window_bounds = array<i64: 8, 128>}]} {
    %c0 = arith.constant 0 : index
    %c0_0 = arith.constant 0 : index
    %0 = vector.load %arg1[%c0, %c0_0] : memref<8x2048xbf16, #tpu.memory_space<vmem>>, vector<8x2048xbf16>
    %c0_1 = arith.constant 0 : index
    %c0_2 = arith.constant 0 : index
    %1 = vector.load %arg2[%c0_1, %c0_2] : memref<2048x256xbf16, #tpu.memory_space<vmem>>, vector<2048x256xbf16>
    %cst = arith.constant dense<0.000000e+00> : vector<8x256xf32>
    %2 = tpu.matmul %0, %1, %cst {dimension_numbers = #tpu.dot_dimension_numbers<[1], [0], [0], [1], [0, 0, 1, 1], [], []>} : vector<8x2048xbf16>, vector<2048x256xbf16>, vector<8x256xf32> -> vector<8x256xf32>
    %c0_3 = arith.constant 0 : index
    %c0_4 = arith.constant 0 : index
    %3 = vector.load %arg3[%c0_3, %c0_4] : memref<1x256xf32, #tpu.memory_space<vmem>>, vector<1x256xf32>
    %4 = vector.broadcast %3 : vector<1x256xf32> to vector<8x256xf32>
    %5 = arith.addf %2, %4 : vector<8x256xf32>
    %cst_5 = arith.constant 2.000000e-01 : f32
    %6 = vector.broadcast %cst_5 : f32 to vector<8x256xf32>
    %7 = arith.mulf %5, %6 : vector<8x256xf32>
    %8 = arith.maximumf %5, %7 : vector<8x256xf32>
    %9 = arith.truncf %8 : vector<8x256xf32> to vector<8x256xbf16>
    %c0_6 = arith.constant 0 : index
    %c0_7 = arith.constant 0 : index
    %10 = vector.load %arg4[%c0_6, %c0_7] : memref<256x128xbf16, #tpu.memory_space<vmem>>, vector<256x128xbf16>
    %cst_8 = arith.constant dense<0.000000e+00> : vector<8x128xf32>
    %11 = tpu.matmul %9, %10, %cst_8 {dimension_numbers = #tpu.dot_dimension_numbers<[1], [0], [0], [1], [0, 0, 1, 1], [], []>} : vector<8x256xbf16>, vector<256x128xbf16>, vector<8x128xf32> -> vector<8x128xf32>
    %c0_9 = arith.constant 0 : index
    %c0_10 = arith.constant 0 : index
    %12 = vector.load %arg5[%c0_9, %c0_10] : memref<1x128xf32, #tpu.memory_space<vmem>>, vector<1x128xf32>
    %13 = vector.broadcast %12 : vector<1x128xf32> to vector<8x128xf32>
    %14 = arith.addf %11, %13 : vector<8x128xf32>
    %c0_11 = arith.constant 0 : index
    %c0_12 = arith.constant 0 : index
    %15 = vector.load %arg6[%c0_11, %c0_12] : memref<8x128xf32, #tpu.memory_space<vmem>>, vector<8x128xf32>
    tpu.vector_store %arg6[%c0_11, %c0_12], %14 {strides = array<i32>} : memref<8x128xf32, #tpu.memory_space<vmem>>, vector<8x128xf32>,
    return
  }
  func.func @transform_0(%arg0: i32) -> (i32, i32) {
    %c0_i32 = arith.constant 0 : i32
    %c0_i32_0 = arith.constant 0 : i32
    return %arg0, %c0_i32 : i32, i32
  }
  func.func @transform_1(%arg0: i32) -> (i32, i32) {
    %c0_i32 = arith.constant 0 : i32
    %c0_i32_0 = arith.constant 0 : i32
    %c0_i32_1 = arith.constant 0 : i32
    return %c0_i32, %c0_i32_0 : i32, i32
  }
  func.func @transform_2(%arg0: i32) -> (i32, i32) {
    %c0_i32 = arith.constant 0 : i32
    %c0_i32_0 = arith.constant 0 : i32
    %c0_i32_1 = arith.constant 0 : i32
    return %c0_i32, %c0_i32_0 : i32, i32
  }
  func.func @transform_3(%arg0: i32) -> (i32, i32) {
    %c0_i32 = arith.constant 0 : i32
    %c0_i32_0 = arith.constant 0 : i32
    %c0_i32_1 = arith.constant 0 : i32
    return %c0_i32, %c0_i32_0 : i32, i32
  }
  func.func @transform_4(%arg0: i32) -> (i32, i32) {
    %c0_i32 = arith.constant 0 : i32
    %c0_i32_0 = arith.constant 0 : i32
    %c0_i32_1 = arith.constant 0 : i32
    return %c0_i32, %c0_i32_0 : i32, i32
  }
  func.func @transform_5(%arg0: i32) -> (i32, i32) {
    %c0_i32 = arith.constant 0 : i32
    %c0_i32_0 = arith.constant 0 : i32
    return %arg0, %c0_i32 : i32, i32
  }
}

</mosaic_0001>

<bundles_post_ra>
// kernel: ssrtvd_d_t_forward.3
= control target key start
LH: loop header
LB: loop body
LE: loop exit
PB: predicated region body
PF: predicated region fallthrough
CT: control target
= control target key end

     0   :  { %v1539_v0 = vmov 0.0   ;;  %vm1540_vm0 = vmmov 0   ;;  %vm246_vm1 = vcmask 392192   ;;  %s1899_s1 = inlined_call_operand.vmem [shape: bf16[48,128], index: 1, kind: input, shape index: {}]   ;;  %s1900_s0 = inlined_call_operand.vmem [shape: bf16[456,48], index: 0, kind: input, shape index: {}]   ;;  %s1901_s2 = inlined_call_operand.vmem [shape: f32[1,128], index: 2, kind: input, shape index: {}]   ;;  %s1902_s3 = inlined_call_operand.vmem [shape: bf16[456,128], index: 3, kind: output, shape index: {}]  }
   0x1   :  { %1377 = vmatprep.subr.bf16.mxu0 %v1539_v0  ;;  %v1507_v1 = vld [vmem:[%s1899_s1 + $0x10] sm:$0xff]   ;;  %1499 = vmatprep.subr.bf16.mxu1 %v1539_v0  ;;  %v1508_v2 = vld [vmem:[%s1899_s1 + $0x8] sm:$0xff]   ;;  %v1509_v3 = vld [vmem:[%s1899_s1] sm:$0xff]  }
   0x2   :  { %1383 = vmatprep.mubr.msk.bf16.mxu0 %vm1540_vm0, %v1539_v0  ;;  %1443 = vmatprep.mubr.msk.bf16.mxu1 %vm1540_vm0, %v1539_v0  ;;  %v1510_v4 = vld [vmem:[%s1900_s0] sm:$0xff]   ;;  %v1511_v5 = vld [vmem:[%s1900_s0 + $0x78] sm:$0xff]   ;;  %v1512_v6 = vld [vmem:[%s1900_s0 + $0x8] sm:$0xff]  }
   0x3   :  { %1378 = vmatpush3.bf16.msra.mxu0 %v1507_v1  ;;  %1502 = vmatpush3.bf16.msra.mxu1 %v1507_v1  ;;  %v1513_v7 = vld [vmem:[%s1900_s0 + $0x80] sm:$0xff]   ;;  %v1514_v8 = vld [vmem:[%s1900_s0 + $0x10] sm:$0xff]   ;;  %v1515_v9 = vld [vmem:[%s1900_s0 + $0x88] sm:$0xff]  }
   0x4   :  { %1379 = vmatprep.subr.bf16.mxu0 %v1539_v0  ;;  %1500 = vmatprep.subr.bf16.mxu1 %v1539_v0  ;;  %v1516_v10 = vld [vmem:[%s1900_s0 + $0x18] sm:$0xff]   ;;  %v1517_v11 = vld [vmem:[%s1900_s0 + $0x90] sm:$0xff]   ;;  %v1518_v12 = vld [vmem:[%s1900_s0 + $0x20] sm:$0xff]  }
   0x5   :  { %v1519_v13 = vld [vmem:[%s1900_s0 + $0x98] sm:$0xff]   ;;  %v1520_v14 = vld [vmem:[%s1900_s0 + $0x28] sm:$0xff]   ;;  %v1521_v15 = vld [vmem:[%s1900_s0 + $0xa0] sm:$0xff]  }
   0x6   :  { %v1522_v16 = vld [vmem:[%s1900_s0 + $0x30] sm:$0xff]   ;;  %v1523_v17 = vld [vmem:[%s1900_s0 + $0xa8] sm:$0xff]   ;;  %v1524_v18 = vld [vmem:[%s1900_s0 + $0x38] sm:$0xff]  }
   0x7   :  { %1380 = vmatpush3.bf16.msra.mxu0 %v1508_v2  ;;  %1503 = vmatpush3.bf16.msra.mxu1 %v1508_v2  ;;  %v1525_v19 = vld [vmem:[%s1900_s0 + $0xb0] sm:$0xff]   ;;  %v1526_v20 = vld [vmem:[%s1900_s0 + $0x40] sm:$0xff]   ;;  %v1527_v21 = vld [vmem:[%s1900_s0 + $0xb8] sm:$0xff]  }
   0x8   :  { %1381 = vmatprep.subr.bf16.mxu0 %v1539_v0  ;;  %1501 = vmatprep.subr.bf16.mxu1 %v1539_v0  ;;  %v1528_v22 = vld [vmem:[%s1900_s0 + $0x48] sm:$0xff]   ;;  %v1529_v23 = vld [vmem:[%s1900_s0 + $0xc0] sm:$0xff]   ;;  %v1530_v24 = vld [vmem:[%s1900_s0 + $0x50] sm:$0xff]  }
   0x9   :  { %v1531_v25 = vld [vmem:[%s1900_s0 + $0xc8] sm:$0xff]   ;;  %v1532_v26 = vld [vmem:[%s1900_s0 + $0x58] sm:$0xff]   ;;  %v1533_v27 = vld [vmem:[%s1900_s0 + $0xd0] sm:$0xff]  }
   0xa   :  { %v1534_v28 = vld [vmem:[%s1900_s0 + $0x60] sm:$0xff]   ;;  %v1535_v29 = vld [vmem:[%s1900_s0 + $0xd8] sm:$0xff]   ;;  %v1536_v30 = vld [vmem:[%s1900_s0 + $0x68] sm:$0xff]  }
   0xb   :  { %1382 = vmatpush3.bf16.msra.mxu0 %v1509_v3  ;;  %1504 = vmatpush3.bf16.msra.mxu1 %v1509_v3  ;;  %v1537_v31 = vld [vmem:[%s1900_s0 + $0xe0] ss:$0 sps:$4 sm:$0xff]   ;;  %v1538_v32 = vld [vmem:[%s1900_s0 + $0x70] sm:$0xff]  }
   0xc   :  { %v1753_v33 = vld [vmem:[%s1901_s2] ss:$0 sm:$0xff] }
   0xe   :  { %1384 = vmatmul.mubr.msk.bf16.vlgmr.msra.gmra.mxu0 %vm246_vm1, %v1510_v4  ;;  %1444 = vmatmul.mubr.msk.bf16.vlgmr.msra.gmra.mxu1 %vm246_vm1, %v1511_v5 }
   0xf   :  { %1387 = vmatprep.mubr.msk.bf16.mxu0 %vm1540_vm0, %v1539_v0  ;;  %1447 = vmatprep.mubr.msk.bf16.mxu1 %vm1540_vm0, %v1539_v0 }
  0x16   :  { %1388 = vmatmul.mubr.msk.bf16.gmra.mxu0 %vm246_vm1, %v1512_v6  ;;  %1448 = vmatmul.mubr.msk.bf16.gmra.mxu1 %vm246_vm1, %v1513_v7 }
  0x17   :  { %1391 = vmatprep.mubr.msk.bf16.mxu0 %vm1540_vm0, %v1539_v0  ;;  %1451 = vmatprep.mubr.msk.bf16.mxu1 %vm1540_vm0, %v1539_v0 }
  0x1e   :  { %1392 = vmatmul.mubr.msk.bf16.gmra.mxu0 %vm246_vm1, %v1514_v8  ;;  %1452 = vmatmul.mubr.msk.bf16.gmra.mxu1 %vm246_vm1, %v1515_v9 }
  0x1f   :  { %1395 = vmatprep.mubr.msk.bf16.mxu0 %vm1540_vm0, %v1539_v0  ;;  %1455 = vmatprep.mubr.msk.bf16.mxu1 %vm1540_vm0, %v1539_v0 }
  0x26   :  { %1396 = vmatmul.mubr.msk.bf16.gmra.mxu0 %vm246_vm1, %v1516_v10  ;;  %1456 = vmatmul.mubr.msk.bf16.gmra.mxu1 %vm246_vm1, %v1517_v11 }
  0x27   :  { %1399 = vmatprep.mubr.msk.bf16.mxu0 %vm1540_vm0, %v1539_v0  ;;  %1459 = vmatprep.mubr.msk.bf16.mxu1 %vm1540_vm0, %v1539_v0 }
  0x2e   :  { %1400 = vmatmul.mubr.msk.bf16.gmra.mxu0 %vm246_vm1, %v1518_v12  ;;  %1460 = vmatmul.mubr.msk.bf16.gmra.mxu1 %vm246_vm1, %v1519_v13 }
  0x2f   :  { %1403 = vmatprep.mubr.msk.bf16.mxu0 %vm1540_vm0, %v1539_v0  ;;  %1463 = vmatprep.mubr.msk.bf16.mxu1 %vm1540_vm0, %v1539_v0 }
  0x36   :  { %1404 = vmatmul.mubr.msk.bf16.gmra.mxu0 %vm246_vm1, %v1520_v14  ;;  %1464 = vmatmul.mubr.msk.bf16.gmra.mxu1 %vm246_vm1, %v1521_v15 }
  0x37   :  { %1407 = vmatprep.mubr.msk.bf16.mxu0 %vm1540_vm0, %v1539_v0  ;;  %1467 = vmatprep.mubr.msk.bf16.mxu1 %vm1540_vm0, %v1539_v0 }
  0x3e   :  { %1408 = vmatmul.mubr.msk.bf16.gmra.mxu0 %vm246_vm1, %v1522_v16  ;;  %1468 = vmatmul.mubr.msk.bf16.gmra.mxu1 %vm246_vm1, %v1523_v17 }
  0x3f   :  { %1411 = vmatprep.mubr.msk.bf16.mxu0 %vm1540_vm0, %v1539_v0  ;;  %1471 = vmatprep.mubr.msk.bf16.mxu1 %vm1540_vm0, %v1539_v0 }
  0x46   :  { %1412 = vmatmul.mubr.msk.bf16.gmra.mxu0 %vm246_vm1, %v1524_v18  ;;  %1472 = vmatmul.mubr.msk.bf16.gmra.mxu1 %vm246_vm1, %v1525_v19 }
  0x47   :  { %1415 = vmatprep.mubr.msk.bf16.mxu0 %vm1540_vm0, %v1539_v0  ;;  %1475 = vmatprep.mubr.msk.bf16.mxu1 %vm1540_vm0, %v1539_v0 }
  0x4e   :  { %1416 = vmatmul.mubr.msk.bf16.gmra.mxu0 %vm246_vm1, %v1526_v20  ;;  %1476 = vmatmul.mubr.msk.bf16.gmra.mxu1 %vm246_vm1, %v1527_v21 }
  0x4f   :  { %1419 = vmatprep.mubr.msk.bf16.mxu0 %vm1540_vm0, %v1539_v0  ;;  %1479 = vmatprep.mubr.msk.bf16.mxu1 %vm1540_vm0, %v1539_v0 }
  0x56   :  { %1420 = vmatmul.mubr.msk.bf16.gmra.mxu0 %vm246_vm1, %v1528_v22  ;;  %1480 = vmatmul.mubr.msk.bf16.gmra.mxu1 %vm246_vm1, %v1529_v23 }
  0x57   :  { %1423 = vmatprep.mubr.msk.bf16.mxu0 %vm1540_vm0, %v1539_v0  ;;  %1483 = vmatprep.mubr.msk.bf16.mxu1 %vm1540_vm0, %v1539_v0 }
  0x5e   :  { %1424 = vmatmul.mubr.msk.bf16.gmra.mxu0 %vm246_vm1, %v1530_v24  ;;  %1484 = vmatmul.mubr.msk.bf16.gmra.mxu1 %vm246_vm1, %v1531_v25 }
  0x5f   :  { %1427 = vmatprep.mubr.msk.bf16.mxu0 %vm1540_vm0, %v1539_v0  ;;  %1487 = vmatprep.mubr.msk.bf16.mxu1 %vm1540_vm0, %v1539_v0 }
  0x66   :  { %1428 = vmatmul.mubr.msk.bf16.gmra.mxu0 %vm246_vm1, %v1532_v26  ;;  %1488 = vmatmul.mubr.msk.bf16.gmra.mxu1 %vm246_vm1, %v1533_v27 }
  0x67   :  { %1431 = vmatprep.mubr.msk.bf16.mxu0 %vm1540_vm0, %v1539_v0  ;;  %1491 = vmatprep.mubr.msk.bf16.mxu1 %vm1540_vm0, %v1539_v0 }
  0x6e   :  { %1432 = vmatmul.mubr.msk.bf16.gmra.mxu0 %vm246_vm1, %v1534_v28  ;;  %1492 = vmatmul.mubr.msk.bf16.gmra.mxu1 %vm246_vm1, %v1535_v29 }
  0x6f   :  { %1435 = vmatprep.mubr.msk.bf16.mxu0 %vm1540_vm0, %v1539_v0  ;;  %1495 = vmatprep.mubr.msk.bf16.mxu1 %vm1540_vm0, %v1539_v0 }
  0x76   :  { %1436 = vmatmul.mubr.msk.bf16.gmra.mxu0 %vm246_vm1, %v1536_v30  ;;  %1496 = vmatmul.mubr.msk.bf16.gmra.mxu1 %vm246_vm1, %v1537_v31 }
  0x77   :  { %1439 = vmatprep.mubr.msk.bf16.mxu0 %vm1540_vm0, %v1539_v0 }
  0x7e   :  { %1440 = vmatmul.mubr.msk.bf16.gmra.mxu0 %vm246_vm1, %v1538_v32 }
  0xce   :  { %v368_v34 = vpop.f32.mrf.mxu0  ;;  %v488_v35 = vpop.f32.mrf.mxu1 }
  0xcf   :  { %v369_v36 = vadd.f32 %v1753_v33, %v368_v34  ;;  %v489_v37 = vadd.f32 %v1753_v33, %v488_v35 }
  0xd0   :  { %v1385_v38 = vpop.f32.mrf.mxu0  ;;  %v1445_v39 = vpop.f32.mrf.mxu1 }
  0xd1   :  { %v628_v40 = vmul.f32 0.2, %v489_v37  ;;  %v598_v41 = vmul.f32 0.2, %v369_v36 }
  0xd2   :  { %v371_v42 = vpop.f32.mrf.mxu0  ;;  %v491_v43 = vpop.f32.mrf.mxu1 }
  0xd3   :  { %v372_v44 = vadd.f32 %v1753_v33, %v371_v42  ;;  %v492_v45 = vadd.f32 %v1753_v33, %v491_v43  ;;  %v685_v49 = vmax.f32 %v489_v37, %v628_v40  ;;  %v655_v51 = vmax.f32 %v369_v36, %v598_v41 }
  0xd4   :  { %v1386_v46 = vpop.f32.mrf.mxu0  ;;  %v1446_v47 = vpop.f32.mrf.mxu1 }
  0xd5   :  { %v599_v48 = vmul.f32 0.2, %v372_v44  ;;  %v629_v50 = vmul.f32 0.2, %v492_v45 }
  0xd6   :  { %v376_v52 = vpop.f32.mrf.mxu0  ;;  %v496_v53 = vpop.f32.mrf.mxu1 }
  0xd7   :  { %v656_v54 = vmax.f32 %v372_v44, %v599_v48  ;;  %v377_v55 = vadd.f32 %v1753_v33, %v376_v52  ;;  %v686_v56 = vmax.f32 %v492_v45, %v629_v50  ;;  %v497_v57 = vadd.f32 %v1753_v33, %v496_v53 }
  0xd8   :  { %v1389_v58 = vpop.f32.mrf.mxu0  ;;  %v1449_v59 = vpop.f32.mrf.mxu1 }
  0xd9   :  { %v1181_v60 = vpack.c.bf16 %v656_v54, %v655_v51  ;;  %v1256_v61 = vpack.c.bf16 %v686_v56, %v685_v49  ;;  %v630_v62 = vmul.f32 0.2, %v497_v57  ;;  %v600_v63 = vmul.f32 0.2, %v377_v55 }
  0xda   :  { %v379_v0 = vpop.f32.mrf.mxu0  ;;  %v499_v1 = vpop.f32.mrf.mxu1 }
  0xdb   :  { %1182 = vst [vmem:[%s1902_s3] sm:$0xff] %v1181_v60   ;;  %1332 = vst [vmem:[%s1902_s3 + $0x78] sm:$0xff] %v1256_v61   ;;  %v380_v2 = vadd.f32 %v1753_v33, %v379_v0  ;;  %v500_v3 = vadd.f32 %v1753_v33, %v499_v1  ;;  %v687_v7 = vmax.f32 %v497_v57, %v630_v62 }
  0xdc   :  { %v1390_v4 = vpop.f32.mrf.mxu0  ;;  %v1450_v5 = vpop.f32.mrf.mxu1  ;;  %v657_v9 = vmax.f32 %v377_v55, %v600_v63 }
  0xdd   :  { %v601_v6 = vmul.f32 0.2, %v380_v2  ;;  %v631_v8 = vmul.f32 0.2, %v500_v3 }
  0xde   :  { %v384_v10 = vpop.f32.mrf.mxu0  ;;  %v504_v11 = vpop.f32.mrf.mxu1 }
  0xdf   :  { %v658_v12 = vmax.f32 %v380_v2, %v601_v6  ;;  %v385_v13 = vadd.f32 %v1753_v33, %v384_v10  ;;  %v688_v14 = vmax.f32 %v500_v3, %v631_v8  ;;  %v505_v15 = vadd.f32 %v1753_v33, %v504_v11 }
  0xe0   :  { %v1393_v16 = vpop.f32.mrf.mxu0  ;;  %v1453_v17 = vpop.f32.mrf.mxu1 }
  0xe1   :  { %v1186_v18 = vpack.c.bf16 %v658_v12, %v657_v9  ;;  %v1261_v19 = vpack.c.bf16 %v688_v14, %v687_v7  ;;  %v632_v20 = vmul.f32 0.2, %v505_v15  ;;  %v602_v21 = vmul.f32 0.2, %v385_v13 }
  0xe2   :  { %v387_v22 = vpop.f32.mrf.mxu0  ;;  %v507_v23 = vpop.f32.mrf.mxu1 }
  0xe3   :  { %1318 = vst [vmem:[%s1902_s3 + $0x8] sm:$0xff] %v1186_v18   ;;  %1333 = vst [vmem:[%s1902_s3 + $0x80] sm:$0xff] %v1261_v19   ;;  %v388_v24 = vadd.f32 %v1753_v33, %v387_v22  ;;  %v508_v25 = vadd.f32 %v1753_v33, %v507_v23  ;;  %v689_v29 = vmax.f32 %v505_v15, %v632_v20 }
  0xe4   :  { %v1394_v26 = vpop.f32.mrf.mxu0  ;;  %v1454_v27 = vpop.f32.mrf.mxu1  ;;  %v659_v31 = vmax.f32 %v385_v13, %v602_v21 }
  0xe5   :  { %v603_v28 = vmul.f32 0.2, %v388_v24  ;;  %v633_v30 = vmul.f32 0.2, %v508_v25 }
  0xe6   :  { %v392_v32 = vpop.f32.mrf.mxu0  ;;  %v512_v34 = vpop.f32.mrf.mxu1 }
  0xe7   :  { %v660_v35 = vmax.f32 %v388_v24, %v603_v28  ;;  %v393_v36 = vadd.f32 %v1753_v33, %v392_v32  ;;  %v690_v37 = vmax.f32 %v508_v25, %v633_v30  ;;  %v513_v38 = vadd.f32 %v1753_v33, %v512_v34 }
  0xe8   :  { %v1397_v39 = vpop.f32.mrf.mxu0  ;;  %v1457_v40 = vpop.f32.mrf.mxu1 }
  0xe9   :  { %v1191_v41 = vpack.c.bf16 %v660_v35, %v659_v31  ;;  %v1266_v42 = vpack.c.bf16 %v690_v37, %v689_v29  ;;  %v634_v43 = vmul.f32 0.2, %v513_v38  ;;  %v604_v44 = vmul.f32 0.2, %v393_v36 }
  0xea   :  { %v395_v45 = vpop.f32.mrf.mxu0  ;;  %v515_v46 = vpop.f32.mrf.mxu1 }
  0xeb   :  { %1319 = vst [vmem:[%s1902_s3 + $0x10] sm:$0xff] %v1191_v41   ;;  %1334 = vst [vmem:[%s1902_s3 + $0x88] sm:$0xff] %v1266_v42   ;;  %v396_v47 = vadd.f32 %v1753_v33, %v395_v45  ;;  %v516_v48 = vadd.f32 %v1753_v33, %v515_v46  ;;  %v691_v52 = vmax.f32 %v513_v38, %v634_v43 }
  0xec   :  { %v1398_v49 = vpop.f32.mrf.mxu0  ;;  %v1458_v50 = vpop.f32.mrf.mxu1  ;;  %v661_v54 = vmax.f32 %v393_v36, %v604_v44 }
  0xed   :  { %v605_v51 = vmul.f32 0.2, %v396_v47  ;;  %v635_v53 = vmul.f32 0.2, %v516_v48 }
  0xee   :  { %v400_v55 = vpop.f32.mrf.mxu0  ;;  %v520_v56 = vpop.f32.mrf.mxu1 }
  0xef   :  { %v662_v57 = vmax.f32 %v396_v47, %v605_v51  ;;  %v401_v58 = vadd.f32 %v1753_v33, %v400_v55  ;;  %v692_v59 = vmax.f32 %v516_v48, %v635_v53  ;;  %v521_v60 = vadd.f32 %v1753_v33, %v520_v56 }
  0xf0   :  { %v1401_v61 = vpop.f32.mrf.mxu0  ;;  %v1461_v62 = vpop.f32.mrf.mxu1 }
  0xf1   :  { %v1196_v63 = vpack.c.bf16 %v662_v57, %v661_v54  ;;  %v1271_v0 = vpack.c.bf16 %v692_v59, %v691_v52  ;;  %v636_v1 = vmul.f32 0.2, %v521_v60  ;;  %v606_v2 = vmul.f32 0.2, %v401_v58 }
  0xf2   :  { %v403_v3 = vpop.f32.mrf.mxu0  ;;  %v523_v4 = vpop.f32.mrf.mxu1 }
  0xf3   :  { %1320 = vst [vmem:[%s1902_s3 + $0x18] sm:$0xff] %v1196_v63   ;;  %1335 = vst [vmem:[%s1902_s3 + $0x90] sm:$0xff] %v1271_v0   ;;  %v404_v5 = vadd.f32 %v1753_v33, %v403_v3  ;;  %v524_v6 = vadd.f32 %v1753_v33, %v523_v4  ;;  %v693_v10 = vmax.f32 %v521_v60, %v636_v1 }
  0xf4   :  { %v1402_v7 = vpop.f32.mrf.mxu0  ;;  %v1462_v8 = vpop.f32.mrf.mxu1  ;;  %v663_v12 = vmax.f32 %v401_v58, %v606_v2 }
  0xf5   :  { %v607_v9 = vmul.f32 0.2, %v404_v5  ;;  %v637_v11 = vmul.f32 0.2, %v524_v6 }
  0xf6   :  { %v408_v13 = vpop.f32.mrf.mxu0  ;;  %v528_v14 = vpop.f32.mrf.mxu1 }
  0xf7   :  { %v664_v15 = vmax.f32 %v404_v5, %v607_v9  ;;  %v409_v16 = vadd.f32 %v1753_v33, %v408_v13  ;;  %v694_v17 = vmax.f32 %v524_v6, %v637_v11  ;;  %v529_v18 = vadd.f32 %v1753_v33, %v528_v14 }
  0xf8   :  { %v1405_v19 = vpop.f32.mrf.mxu0  ;;  %v1465_v20 = vpop.f32.mrf.mxu1 }
  0xf9   :  { %v1201_v21 = vpack.c.bf16 %v664_v15, %v663_v12  ;;  %v1276_v22 = vpack.c.bf16 %v694_v17, %v693_v10  ;;  %v638_v23 = vmul.f32 0.2, %v529_v18  ;;  %v608_v24 = vmul.f32 0.2, %v409_v16 }
  0xfa   :  { %v411_v25 = vpop.f32.mrf.mxu0  ;;  %v531_v26 = vpop.f32.mrf.mxu1 }
  0xfb   :  { %1321 = vst [vmem:[%s1902_s3 + $0x20] sm:$0xff] %v1201_v21   ;;  %1336 = vst [vmem:[%s1902_s3 + $0x98] sm:$0xff] %v1276_v22   ;;  %v412_v27 = vadd.f32 %v1753_v33, %v411_v25  ;;  %v532_v28 = vadd.f32 %v1753_v33, %v531_v26  ;;  %v695_v32 = vmax.f32 %v529_v18, %v638_v23 }
  0xfc   :  { %v1406_v29 = vpop.f32.mrf.mxu0  ;;  %v1466_v30 = vpop.f32.mrf.mxu1  ;;  %v665_v35 = vmax.f32 %v409_v16, %v608_v24 }
  0xfd   :  { %v609_v31 = vmul.f32 0.2, %v412_v27  ;;  %v639_v34 = vmul.f32 0.2, %v532_v28 }
  0xfe   :  { %v416_v36 = vpop.f32.mrf.mxu0  ;;  %v536_v37 = vpop.f32.mrf.mxu1 }
  0xff   :  { %v666_v38 = vmax.f32 %v412_v27, %v609_v31  ;;  %v417_v39 = vadd.f32 %v1753_v33, %v416_v36  ;;  %v696_v40 = vmax.f32 %v532_v28, %v639_v34  ;;  %v537_v41 = vadd.f32 %v1753_v33, %v536_v37 }
 0x100   :  { %v1409_v42 = vpop.f32.mrf.mxu0  ;;  %v1469_v43 = vpop.f32.mrf.mxu1 }
 0x101   :  { %v1206_v44 = vpack.c.bf16 %v666_v38, %v665_v35  ;;  %v1281_v45 = vpack.c.bf16 %v696_v40, %v695_v32  ;;  %v640_v46 = vmul.f32 0.2, %v537_v41  ;;  %v610_v47 = vmul.f32 0.2, %v417_v39 }
 0x102   :  { %v419_v48 = vpop.f32.mrf.mxu0  ;;  %v539_v49 = vpop.f32.mrf.mxu1 }
 0x103   :  { %1322 = vst [vmem:[%s1902_s3 + $0x28] sm:$0xff] %v1206_v44   ;;  %1337 = vst [vmem:[%s1902_s3 + $0xa0] sm:$0xff] %v1281_v45   ;;  %v420_v50 = vadd.f32 %v1753_v33, %v419_v48  ;;  %v540_v51 = vadd.f32 %v1753_v33, %v539_v49  ;;  %v697_v55 = vmax.f32 %v537_v41, %v640_v46 }
 0x104   :  { %v1410_v52 = vpop.f32.mrf.mxu0  ;;  %v1470_v53 = vpop.f32.mrf.mxu1  ;;  %v667_v57 = vmax.f32 %v417_v39, %v610_v47 }
 0x105   :  { %v611_v54 = vmul.f32 0.2, %v420_v50  ;;  %v641_v56 = vmul.f32 0.2, %v540_v51 }
 0x106   :  { %v424_v58 = vpop.f32.mrf.mxu0  ;;  %v544_v59 = vpop.f32.mrf.mxu1 }
 0x107   :  { %v668_v60 = vmax.f32 %v420_v50, %v611_v54  ;;  %v425_v61 = vadd.f32 %v1753_v33, %v424_v58  ;;  %v698_v62 = vmax.f32 %v540_v51, %v641_v56  ;;  %v545_v63 = vadd.f32 %v1753_v33, %v544_v59 }
 0x108   :  { %v1413_v0 = vpop.f32.mrf.mxu0  ;;  %v1473_v1 = vpop.f32.mrf.mxu1 }
 0x109   :  { %v1211_v2 = vpack.c.bf16 %v668_v60, %v667_v57  ;;  %v1286_v3 = vpack.c.bf16 %v698_v62, %v697_v55  ;;  %v642_v4 = vmul.f32 0.2, %v545_v63  ;;  %v612_v5 = vmul.f32 0.2, %v425_v61 }
 0x10a   :  { %v427_v6 = vpop.f32.mrf.mxu0  ;;  %v547_v7 = vpop.f32.mrf.mxu1 }
 0x10b   :  { %1323 = vst [vmem:[%s1902_s3 + $0x30] sm:$0xff] %v1211_v2   ;;  %1338 = vst [vmem:[%s1902_s3 + $0xa8] sm:$0xff] %v1286_v3   ;;  %v428_v8 = vadd.f32 %v1753_v33, %v427_v6  ;;  %v548_v9 = vadd.f32 %v1753_v33, %v547_v7  ;;  %v699_v13 = vmax.f32 %v545_v63, %v642_v4 }
 0x10c   :  { %v1414_v10 = vpop.f32.mrf.mxu0  ;;  %v1474_v11 = vpop.f32.mrf.mxu1  ;;  %v669_v15 = vmax.f32 %v425_v61, %v612_v5 }
 0x10d   :  { %v613_v12 = vmul.f32 0.2, %v428_v8  ;;  %v643_v14 = vmul.f32 0.2, %v548_v9 }
 0x10e   :  { %v432_v16 = vpop.f32.mrf.mxu0  ;;  %v552_v17 = vpop.f32.mrf.mxu1 }
 0x10f   :  { %v670_v18 = vmax.f32 %v428_v8, %v613_v12  ;;  %v433_v19 = vadd.f32 %v1753_v33, %v432_v16  ;;  %v700_v20 = vmax.f32 %v548_v9, %v643_v14  ;;  %v553_v21 = vadd.f32 %v1753_v33, %v552_v17 }
 0x110   :  { %v1417_v22 = vpop.f32.mrf.mxu0  ;;  %v1477_v23 = vpop.f32.mrf.mxu1 }
 0x111   :  { %v1216_v24 = vpack.c.bf16 %v670_v18, %v669_v15  ;;  %v1291_v25 = vpack.c.bf16 %v700_v20, %v699_v13  ;;  %v644_v26 = vmul.f32 0.2, %v553_v21  ;;  %v614_v27 = vmul.f32 0.2, %v433_v19 }
 0x112   :  { %v435_v28 = vpop.f32.mrf.mxu0  ;;  %v555_v29 = vpop.f32.mrf.mxu1 }
 0x113   :  { %1324 = vst [vmem:[%s1902_s3 + $0x38] sm:$0xff] %v1216_v24   ;;  %1339 = vst [vmem:[%s1902_s3 + $0xb0] sm:$0xff] %v1291_v25   ;;  %v436_v30 = vadd.f32 %v1753_v33, %v435_v28  ;;  %v556_v31 = vadd.f32 %v1753_v33, %v555_v29  ;;  %v701_v36 = vmax.f32 %v553_v21, %v644_v26 }
 0x114   :  { %v1418_v32 = vpop.f32.mrf.mxu0  ;;  %v1478_v34 = vpop.f32.mrf.mxu1  ;;  %v671_v38 = vmax.f32 %v433_v19, %v614_v27 }
 0x115   :  { %v615_v35 = vmul.f32 0.2, %v436_v30  ;;  %v645_v37 = vmul.f32 0.2, %v556_v31 }
 0x116   :  { %v440_v39 = vpop.f32.mrf.mxu0  ;;  %v560_v40 = vpop.f32.mrf.mxu1 }
 0x117   :  { %v672_v41 = vmax.f32 %v436_v30, %v615_v35  ;;  %v441_v42 = vadd.f32 %v1753_v33, %v440_v39  ;;  %v702_v43 = vmax.f32 %v556_v31, %v645_v37  ;;  %v561_v44 = vadd.f32 %v1753_v33, %v560_v40 }
 0x118   :  { %v1421_v45 = vpop.f32.mrf.mxu0  ;;  %v1481_v46 = vpop.f32.mrf.mxu1 }
 0x119   :  { %v1221_v47 = vpack.c.bf16 %v672_v41, %v671_v38  ;;  %v1296_v48 = vpack.c.bf16 %v702_v43, %v701_v36  ;;  %v646_v49 = vmul.f32 0.2, %v561_v44  ;;  %v616_v50 = vmul.f32 0.2, %v441_v42 }
 0x11a   :  { %v443_v51 = vpop.f32.mrf.mxu0  ;;  %v563_v52 = vpop.f32.mrf.mxu1 }
 0x11b   :  { %1325 = vst [vmem:[%s1902_s3 + $0x40] sm:$0xff] %v1221_v47   ;;  %1340 = vst [vmem:[%s1902_s3 + $0xb8] sm:$0xff] %v1296_v48   ;;  %v444_v53 = vadd.f32 %v1753_v33, %v443_v51  ;;  %v564_v54 = vadd.f32 %v1753_v33, %v563_v52  ;;  %v703_v58 = vmax.f32 %v561_v44, %v646_v49 }
 0x11c   :  { %v1422_v55 = vpop.f32.mrf.mxu0  ;;  %v1482_v56 = vpop.f32.mrf.mxu1  ;;  %v673_v60 = vmax.f32 %v441_v42, %v616_v50 }
 0x11d   :  { %v617_v57 = vmul.f32 0.2, %v444_v53  ;;  %v647_v59 = vmul.f32 0.2, %v564_v54 }
 0x11e   :  { %v448_v61 = vpop.f32.mrf.mxu0  ;;  %v568_v62 = vpop.f32.mrf.mxu1 }
 0x11f   :  { %v674_v63 = vmax.f32 %v444_v53, %v617_v57  ;;  %v449_v0 = vadd.f32 %v1753_v33, %v448_v61  ;;  %v704_v1 = vmax.f32 %v564_v54, %v647_v59  ;;  %v569_v2 = vadd.f32 %v1753_v33, %v568_v62 }
 0x120   :  { %v1425_v3 = vpop.f32.mrf.mxu0  ;;  %v1485_v4 = vpop.f32.mrf.mxu1 }
 0x121   :  { %v1226_v5 = vpack.c.bf16 %v674_v63, %v673_v60  ;;  %v1301_v6 = vpack.c.bf16 %v704_v1, %v703_v58  ;;  %v648_v7 = vmul.f32 0.2, %v569_v2  ;;  %v618_v8 = vmul.f32 0.2, %v449_v0 }
 0x122   :  { %v451_v9 = vpop.f32.mrf.mxu0  ;;  %v571_v10 = vpop.f32.mrf.mxu1 }
 0x123   :  { %1326 = vst [vmem:[%s1902_s3 + $0x48] sm:$0xff] %v1226_v5   ;;  %1341 = vst [vmem:[%s1902_s3 + $0xc0] sm:$0xff] %v1301_v6   ;;  %v452_v11 = vadd.f32 %v1753_v33, %v451_v9  ;;  %v572_v12 = vadd.f32 %v1753_v33, %v571_v10  ;;  %v705_v16 = vmax.f32 %v569_v2, %v648_v7 }
 0x124   :  { %v1426_v13 = vpop.f32.mrf.mxu0  ;;  %v1486_v14 = vpop.f32.mrf.mxu1  ;;  %v675_v18 = vmax.f32 %v449_v0, %v618_v8 }
 0x125   :  { %v619_v15 = vmul.f32 0.2, %v452_v11  ;;  %v649_v17 = vmul.f32 0.2, %v572_v12 }
 0x126   :  { %v456_v19 = vpop.f32.mrf.mxu0  ;;  %v576_v20 = vpop.f32.mrf.mxu1 }
 0x127   :  { %v676_v21 = vmax.f32 %v452_v11, %v619_v15  ;;  %v457_v22 = vadd.f32 %v1753_v33, %v456_v19  ;;  %v706_v23 = vmax.f32 %v572_v12, %v649_v17  ;;  %v577_v24 = vadd.f32 %v1753_v33, %v576_v20 }
 0x128   :  { %v1429_v25 = vpop.f32.mrf.mxu0  ;;  %v1489_v26 = vpop.f32.mrf.mxu1 }
 0x129   :  { %v1231_v27 = vpack.c.bf16 %v676_v21, %v675_v18  ;;  %v1306_v28 = vpack.c.bf16 %v706_v23, %v705_v16  ;;  %v650_v29 = vmul.f32 0.2, %v577_v24  ;;  %v620_v30 = vmul.f32 0.2, %v457_v22 }
 0x12a   :  { %v459_v31 = vpop.f32.mrf.mxu0  ;;  %v579_v32 = vpop.f32.mrf.mxu1 }
 0x12b   :  { %1327 = vst [vmem:[%s1902_s3 + $0x50] sm:$0xff] %v1231_v27   ;;  %1342 = vst [vmem:[%s1902_s3 + $0xc8] sm:$0xff] %v1306_v28   ;;  %v460_v34 = vadd.f32 %v1753_v33, %v459_v31  ;;  %v580_v35 = vadd.f32 %v1753_v33, %v579_v32  ;;  %v707_v39 = vmax.f32 %v577_v24, %v650_v29 }
 0x12c   :  { %v1430_v36 = vpop.f32.mrf.mxu0  ;;  %v1490_v37 = vpop.f32.mrf.mxu1  ;;  %v677_v41 = vmax.f32 %v457_v22, %v620_v30 }
 0x12d   :  { %v621_v38 = vmul.f32 0.2, %v460_v34  ;;  %v651_v40 = vmul.f32 0.2, %v580_v35 }
 0x12e   :  { %v464_v42 = vpop.f32.mrf.mxu0  ;;  %v584_v43 = vpop.f32.mrf.mxu1 }
 0x12f   :  { %v678_v44 = vmax.f32 %v460_v34, %v621_v38  ;;  %v465_v45 = vadd.f32 %v1753_v33, %v464_v42  ;;  %v708_v46 = vmax.f32 %v580_v35, %v651_v40  ;;  %v585_v47 = vadd.f32 %v1753_v33, %v584_v43 }
 0x130   :  { %v1433_v48 = vpop.f32.mrf.mxu0  ;;  %v1493_v49 = vpop.f32.mrf.mxu1 }
 0x131   :  { %v1236_v50 = vpack.c.bf16 %v678_v44, %v677_v41  ;;  %v1311_v51 = vpack.c.bf16 %v708_v46, %v707_v39  ;;  %v652_v52 = vmul.f32 0.2, %v585_v47  ;;  %v622_v53 = vmul.f32 0.2, %v465_v45 }
 0x132   :  { %v467_v54 = vpop.f32.mrf.mxu0  ;;  %v587_v55 = vpop.f32.mrf.mxu1 }
 0x133   :  { %1328 = vst [vmem:[%s1902_s3 + $0x58] sm:$0xff] %v1236_v50   ;;  %1343 = vst [vmem:[%s1902_s3 + $0xd0] sm:$0xff] %v1311_v51   ;;  %v468_v56 = vadd.f32 %v1753_v33, %v467_v54  ;;  %v588_v57 = vadd.f32 %v1753_v33, %v587_v55  ;;  %v709_v61 = vmax.f32 %v585_v47, %v652_v52 }
 0x134   :  { %v1434_v58 = vpop.f32.mrf.mxu0  ;;  %v1494_v59 = vpop.f32.mrf.mxu1  ;;  %v679_v63 = vmax.f32 %v465_v45, %v622_v53 }
 0x135   :  { %v623_v60 = vmul.f32 0.2, %v468_v56  ;;  %v653_v62 = vmul.f32 0.2, %v588_v57 }
 0x136   :  { %v472_v0 = vpop.f32.mrf.mxu0  ;;  %v592_v1 = vpop.f32.mrf.mxu1 }
 0x137   :  { %v680_v2 = vmax.f32 %v468_v56, %v623_v60  ;;  %v473_v3 = vadd.f32 %v1753_v33, %v472_v0  ;;  %v710_v4 = vmax.f32 %v588_v57, %v653_v62  ;;  %v593_v5 = vadd.f32 %v1753_v33, %v592_v1 }
 0x138   :  { %v1437_v6 = vpop.f32.mrf.mxu0  ;;  %v1497_v7 = vpop.f32.mrf.mxu1 }
 0x139   :  { %v1241_v8 = vpack.c.bf16 %v680_v2, %v679_v63  ;;  %v1316_v9 = vpack.c.bf16 %v710_v4, %v709_v61  ;;  %v654_v10 = vmul.f32 0.2, %v593_v5  ;;  %v624_v13 = vmul.f32 0.2, %v473_v3 }
 0x13a   :  { %v475_v11 = vpop.f32.mrf.mxu0  ;;  %v595_v12 = vpop.f32.mrf.mxu1 }
 0x13b   :  { %1329 = vst [vmem:[%s1902_s3 + $0x60] sm:$0xff] %v1241_v8   ;;  %1344 = vst [vmem:[%s1902_s3 + $0xd8] sm:$0xff] %v1316_v9   ;;  %v476_v14 = vadd.f32 %v1753_v33, %v475_v11  ;;  %v711_v15 = vmax.f32 %v593_v5, %v654_v10  ;;  %v681_v21 = vmax.f32 %v473_v3, %v624_v13 }
 0x13c   :  { %v1438_v16 = vpop.f32.mrf.mxu0  ;;  %v1498_v17 = vpop.f32.mrf.mxu1 }
 0x13d   :  { %v625_v18 = vmul.f32 0.2, %v476_v14  ;;  %v1177_v19 = vpack.c.bf16 %v711_v15, %v711_v15 }
 0x13e   :  { %v480_v20 = vpop.f32.mrf.mxu0 }
 0x13f   :  { %v682_v22 = vmax.f32 %v476_v14, %v625_v18  ;;  %997 = vst [vmem:[%s1902_s3 + $0xe0] sm:$0xf] %v1177_v19  ;;  %v481_v23 = vadd.f32 %v1753_v33, %v480_v20 }
 0x140   :  { %v1441_v24 = vpop.f32.mrf.mxu0 }
 0x141   :  { %v1246_v25 = vpack.c.bf16 %v682_v22, %v681_v21  ;;  %v626_v27 = vmul.f32 0.2, %v481_v23 }
 0x142   :  { %v483_v26 = vpop.f32.mrf.mxu0 }
 0x143   :  { %1330 = vst [vmem:[%s1902_s3 + $0x68] sm:$0xff] %v1246_v25   ;;  %v484_v28 = vadd.f32 %v1753_v33, %v483_v26  ;;  %v683_v31 = vmax.f32 %v481_v23, %v626_v27 }
 0x144   :  { %v1442_v29 = vpop.f32.mrf.mxu0 }
 0x145   :  { %v627_v30 = vmul.f32 0.2, %v484_v28 }
 0x147   :  { %v684_v32 = vmax.f32 %v484_v28, %v627_v30 }
 0x149   :  { %v1251_v34 = vpack.c.bf16 %v684_v32, %v683_v31 }
 0x14b   :  { %1331 = vst [vmem:[%s1902_s3 + $0x70] sm:$0xff] %v1251_v34  }

// kernel: ssrtvd_d_t_forward.4
= control target key start
LH: loop header
LB: loop body
LE: loop exit
PB: predicated region body
PF: predicated region fallthrough
CT: control target
= control target key end

     0   :  { %s1925_s1 = inlined_call_operand.vmem [shape: bf16[1024,128], index: 1, kind: input, shape index: {}]   ;;  %s1926_s0 = inlined_call_operand.vmem [shape: bf16[72,1024], index: 0, kind: input, shape index: {}]   ;;  %s1927_s2 = inlined_call_operand.vmem [shape: f32[1,128], index: 2, kind: input, shape index: {}]   ;;  %s1928_s3 = inlined_call_operand.vmem [shape: bf16[72,128], index: 3, kind: output, shape index: {}]  }
   0x1   :  { %v1444_v0 = vld [vmem:[%s1925_s1 + $0x78] sm:$0xff]   ;;  %v1448_v4 = vld [vmem:[%s1925_s1 + $0x70] sm:$0xff]   ;;  %v1452_v8 = vld [vmem:[%s1925_s1 + $0x68] sm:$0xff]  }
   0x2   :  { %v1445_v1 = vld [vmem:[%s1925_s1 + $0xf8] sm:$0xff]   ;;  %1260 = vmatprep.subr.bf16.mxu0 %v1444_v0  ;;  %v1449_v5 = vld [vmem:[%s1925_s1 + $0xf0] sm:$0xff]   ;;  %v1453_v9 = vld [vmem:[%s1925_s1 + $0xe8] sm:$0xff]  }
   0x3   :  { %v1446_v2 = vld [vmem:[%s1925_s1 + $0x38] sm:$0xff]   ;;  %1306 = vmatprep.subr.bf16.mxu1 %v1445_v1  ;;  %v1450_v6 = vld [vmem:[%s1925_s1 + $0x30] sm:$0xff]   ;;  %v1454_v10 = vld [vmem:[%s1925_s1 + $0x28] sm:$0xff]  }
   0x4   :  { %v1447_v3 = vld [vmem:[%s1925_s1 + $0xb8] sm:$0xff]   ;;  %1261 = vmatpush3.bf16.msra.mxu0 %v1446_v2  ;;  %v1451_v7 = vld [vmem:[%s1925_s1 + $0xb0] sm:$0xff]   ;;  %v1455_v11 = vld [vmem:[%s1925_s1 + $0xa8] sm:$0xff]  }
   0x5   :  { %1307 = vmatpush3.bf16.msra.mxu1 %v1447_v3  ;;  %1262 = vmatprep.subr.bf16.mxu0 %v1448_v4  ;;  %v1456_v12 = vld [vmem:[%s1925_s1 + $0x60] sm:$0xff]   ;;  %v1460_v16 = vld [vmem:[%s1925_s1 + $0x58] sm:$0xff]   ;;  %v1464_v20 = vld [vmem:[%s1925_s1 + $0x50] sm:$0xff]  }
   0x6   :  { %1308 = vmatprep.subr.bf16.mxu1 %v1449_v5  ;;  %v1457_v13 = vld [vmem:[%s1925_s1 + $0xe0] sm:$0xff]   ;;  %v1461_v17 = vld [vmem:[%s1925_s1 + $0xd8] sm:$0xff]   ;;  %v1465_v21 = vld [vmem:[%s1925_s1 + $0xd0] sm:$0xff]  }
   0x7   :  { %v1458_v14 = vld [vmem:[%s1925_s1 + $0x20] sm:$0xff]   ;;  %v1462_v18 = vld [vmem:[%s1925_s1 + $0x18] sm:$0xff]   ;;  %v1466_v22 = vld [vmem:[%s1925_s1 + $0x10] sm:$0xff]  }
   0x8   :  { %1263 = vmatpush3.bf16.msra.mxu0 %v1450_v6  ;;  %v1459_v15 = vld [vmem:[%s1925_s1 + $0xa0] sm:$0xff]   ;;  %v1463_v19 = vld [vmem:[%s1925_s1 + $0x98] sm:$0xff]   ;;  %v1467_v23 = vld [vmem:[%s1925_s1 + $0x90] sm:$0xff]  }
   0x9   :  { %1309 = vmatpush3.bf16.msra.mxu1 %v1451_v7  ;;  %1264 = vmatprep.subr.bf16.mxu0 %v1452_v8  ;;  %v1468_v24 = vld [vmem:[%s1925_s1 + $0x48] sm:$0xff]   ;;  %v1472_v28 = vld [vmem:[%s1925_s1 + $0x40] sm:$0xff]   ;;  %v1476_v40 = vld [vmem:[%s1925_s1 + $0x178] sm:$0xff]  }
   0xa   :  { %1310 = vmatprep.subr.bf16.mxu1 %v1453_v9  ;;  %v1469_v25 = vld [vmem:[%s1925_s1 + $0xc8] sm:$0xff]   ;;  %v1473_v29 = vld [vmem:[%s1925_s1 + $0xc0] sm:$0xff]   ;;  %v1477_v41 = vld [vmem:[%s1925_s1 + $0x138] sm:$0xff]  }
   0xb   :  { %v1470_v26 = vld [vmem:[%s1925_s1 + $0x8] sm:$0xff]   ;;  %v1474_v30 = vld [vmem:[%s1925_s1] sm:$0xff]   ;;  %v1478_v42 = vld [vmem:[%s1925_s1 + $0x1f8] sm:$0xff]  }
   0xc   :  { %1265 = vmatpush3.bf16.msra.mxu0 %v1454_v10  ;;  %v1471_v27 = vld [vmem:[%s1925_s1 + $0x88] sm:$0xff]   ;;  %v1475_v31 = vld [vmem:[%s1925_s1 + $0x80] sm:$0xff]   ;;  %v1479_v43 = vld [vmem:[%s1925_s1 + $0x1b8] sm:$0xff]  }
   0xd   :  { %1311 = vmatpush3.bf16.msra.mxu1 %v1455_v11  ;;  %1266 = vmatprep.subr.bf16.mxu0 %v1456_v12  ;;  %v15_v32 = vld [vmem:[%s1926_s0] sm:$0xff]  ;;  %v16_v34 = vld [vmem:[%s1926_s0 + $0x8] sm:$0xff]  ;;  %v1480_v44 = vld [vmem:[%s1925_s1 + $0x170] sm:$0xff]  }
   0xe   :  { %1312 = vmatprep.subr.bf16.mxu1 %v1457_v13  ;;  %v19_v33 = vld [vmem:[%s1926_s0 + $0x20] sm:$0xff]  ;;  %v20_v37 = vld [vmem:[%s1926_s0 + $0x28] sm:$0xff]  ;;  %v1481_v45 = vld [vmem:[%s1925_s1 + $0x130] sm:$0xff]  }
   0xf   :  { %v1115_v35 = vcombine.low %v15_v32, %v19_v33  ;;  %v1116_v36 = vcombine.high %v15_v32, %v19_v33  ;;  %v1117_v38 = vcombine.low %v16_v34, %v20_v37  ;;  %v1118_v39 = vcombine.high %v16_v34, %v20_v37  ;;  %v23_v46 = vld [vmem:[%s1926_s0 + $0x40] sm:$0xff]  ;;  %v24_v49 = vld [vmem:[%s1926_s0 + $0x48] sm:$0xff]  ;;  %v1482_v53 = vld [vmem:[%s1925_s1 + $0x1f0] sm:$0xff]  }
  0x10   :  { %1267 = vmatpush3.bf16.msra.mxu0 %v1458_v14  ;;  %v27_v47 = vld [vmem:[%s1926_s0 + $0x60] sm:$0xff]  ;;  %v28_v50 = vld [vmem:[%s1926_s0 + $0x68] sm:$0xff]  ;;  %v1483_v55 = vld [vmem:[%s1925_s1 + $0x1b0] sm:$0xff]  }
  0x11   :  { %1313 = vmatpush3.bf16.msra.mxu1 %v1459_v15  ;;  %1268 = vmatprep.subr.bf16.mxu0 %v1460_v16  ;;  %v1124_v48 = vcombine.high %v23_v46, %v27_v47  ;;  %v1123_v51 = vcombine.low %v23_v46, %v27_v47  ;;  %v1126_v52 = vcombine.high %v24_v49, %v28_v50  ;;  %v1484_v56 = vld [vmem:[%s1925_s1 + $0x168] sm:$0xff]   ;;  %v31_v60 = vld [vmem:[%s1926_s0 + $0x80] sm:$0xff]  ;;  %v1492_v8 = vld [vmem:[%s1925_s1 + $0x158] sm:$0xff]  }
  0x12   :  { %1314 = vmatprep.subr.bf16.mxu1 %v1461_v17  ;;  %790 = vmatprep.mubr.bf16.mxu0 %v1116_v36  ;;  %v1125_v54 = vcombine.low %v24_v49, %v28_v50  ;;  %v1485_v57 = vld [vmem:[%s1925_s1 + $0x128] sm:$0xff]   ;;  %v35_v61 = vld [vmem:[%s1926_s0 + $0xa0] sm:$0xff]  ;;  %v1493_v9 = vld [vmem:[%s1925_s1 + $0x118] sm:$0xff]  }
  0x13   :  { %862 = vmatprep.mubr.bf16.mxu1 %v1118_v39  ;;  %v1486_v58 = vld [vmem:[%s1925_s1 + $0x1e8] sm:$0xff]   ;;  %v1132_v0 = vcombine.high %v31_v60, %v35_v61  ;;  %v1488_v2 = vld [vmem:[%s1925_s1 + $0x160] sm:$0xff]   ;;  %v1131_v3 = vcombine.low %v31_v60, %v35_v61  ;;  %v1494_v10 = vld [vmem:[%s1925_s1 + $0x1d8] sm:$0xff]  }
  0x14   :  { %1269 = vmatpush3.bf16.msra.mxu0 %v1462_v18  ;;  %v1487_v59 = vld [vmem:[%s1925_s1 + $0x1a8] sm:$0xff]   ;;  %v1489_v5 = vld [vmem:[%s1925_s1 + $0x120] sm:$0xff]   ;;  %v1495_v18 = vld [vmem:[%s1925_s1 + $0x198] sm:$0xff]  }
  0x15   :  { %1315 = vmatpush3.bf16.msra.mxu1 %v1463_v19  ;;  %1270 = vmatprep.subr.bf16.mxu0 %v1464_v20  ;;  %v32_v62 = vld [vmem:[%s1926_s0 + $0x88] sm:$0xff]  ;;  %v1490_v6 = vld [vmem:[%s1925_s1 + $0x1e0] sm:$0xff]   ;;  %v1496_v20 = vld [vmem:[%s1925_s1 + $0x150] sm:$0xff]  }
  0x16   :  { %1316 = vmatprep.subr.bf16.mxu1 %v1465_v21  ;;  %v36_v63 = vld [vmem:[%s1926_s0 + $0xa8] sm:$0xff]  ;;  %v1491_v7 = vld [vmem:[%s1925_s1 + $0x1a0] sm:$0xff]   ;;  %v1497_v21 = vld [vmem:[%s1925_s1 + $0x110] sm:$0xff]  }
  0x17   :  { %v1134_v1 = vcombine.high %v32_v62, %v36_v63  ;;  %v1133_v4 = vcombine.low %v32_v62, %v36_v63  ;;  %v39_v11 = vld [vmem:[%s1926_s0 + $0xc0] sm:$0xff]  ;;  %v40_v13 = vld [vmem:[%s1926_s0 + $0xc8] sm:$0xff]  ;;  %v21_v39 = vld [vmem:[%s1926_s0 + $0x30] sm:$0xff] }
  0x18   :  { %1271 = vmatpush3.bf16.msra.mxu0 %v1466_v22  ;;  %v43_v12 = vld [vmem:[%s1926_s0 + $0xe0] sm:$0xff]  ;;  %v44_v15 = vld [vmem:[%s1926_s0 + $0xe8] sm:$0xff]  ;;  %v1498_v22 = vld [vmem:[%s1925_s1 + $0x1d0] sm:$0xff]  }
  0x19   :  { %1317 = vmatpush3.bf16.msra.mxu1 %v1467_v23  ;;  %1272 = vmatprep.subr.bf16.mxu0 %v1468_v24  ;;  %v1140_v14 = vcombine.high %v39_v11, %v43_v12  ;;  %v1139_v16 = vcombine.low %v39_v11, %v43_v12  ;;  %v1142_v17 = vcombine.high %v40_v13, %v44_v15  ;;  %v1499_v23 = vld [vmem:[%s1925_s1 + $0x190] sm:$0xff]   ;;  %v1500_v24 = vld [vmem:[%s1925_s1 + $0x148] sm:$0xff]   ;;  %v1508_v34 = vld [vmem:[%s1925_s1 + $0x140] sm:$0xff]  }
  0x1a   :  { %1318 = vmatprep.subr.bf16.mxu1 %v1469_v25  ;;  %v1141_v19 = vcombine.low %v40_v13, %v44_v15  ;;  %v47_v25 = vld [vmem:[%s1926_s0 + $0x100] sm:$0xff]  ;;  %v1507_v33 = vld [vmem:[%s1925_s1 + $0x188] sm:$0xff]   ;;  %v26_v47 = vld [vmem:[%s1926_s0 + $0x58] sm:$0xff] }
  0x1b   :  { %v1510_v36 = vld [vmem:[%s1925_s1 + $0x1c0] sm:$0xff]   ;;  %v41_v60 = vld [vmem:[%s1926_s0 + $0xd0] sm:$0xff]  ;;  %v42_v62 = vld [vmem:[%s1926_s0 + $0xd8] sm:$0xff] }
  0x1c   :  { %1273 = vmatpush3.bf16.msra.mxu0 %v1470_v26  ;;  %v48_v26 = vld [vmem:[%s1926_s0 + $0x108] sm:$0xff]  ;;  %v1511_v37 = vld [vmem:[%s1925_s1 + $0x180] sm:$0xff]   ;;  %v45_v61 = vld [vmem:[%s1926_s0 + $0xf0] sm:$0xff] }
  0x1d   :  { %1319 = vmatpush3.bf16.msra.mxu1 %v1471_v27  ;;  %1274 = vmatprep.subr.bf16.mxu0 %v1472_v28  ;;  %v1148_v27 = vcombine.high %v47_v25, %v47_v25  ;;  %v1150_v28 = vcombine.high %v48_v26, %v48_v26  ;;  %v1149_v32 = vcombine.low %v48_v26, %v48_v26  ;;  %v46_v63 = vld [vmem:[%s1926_s0 + $0xf8] sm:$0xff] }
  0x1e   :  { %1320 = vmatprep.subr.bf16.mxu1 %v1473_v29  ;;  %v1503_v29 = vld [vmem:[%s1925_s1 + $0x108] sm:$0xff]  }
  0x20   :  { %1275 = vmatpush3.bf16.msra.mxu0 %v1474_v30  ;;  %v1147_v30 = vcombine.low %v47_v25, %v47_v25 }
  0x21   :  { %1321 = vmatpush3.bf16.msra.mxu1 %v1475_v31  ;;  %1352 = vmatprep.subr.bf16.mxu0 %v1476_v40  ;;  %v1506_v31 = vld [vmem:[%s1925_s1 + $0x1c8] sm:$0xff]   ;;  %v18_v40 = vld [vmem:[%s1926_s0 + $0x18] sm:$0xff] }
  0x22   :  { %1398 = vmatprep.subr.bf16.mxu1 %v1478_v42  ;;  %v22_v42 = vld [vmem:[%s1926_s0 + $0x38] sm:$0xff] }
  0x23   :  { %791 = vmatmul.mubr.bf16.vlgmr.msra.gmra.mxu0 %v1115_v35  ;;  %v1509_v35 = vld [vmem:[%s1925_s1 + $0x100] sm:$0xff]   ;;  %v1122_v46 = vcombine.high %v18_v40, %v22_v42  ;;  %v1121_v49 = vcombine.low %v18_v40, %v22_v42 }
  0x24   :  { %863 = vmatmul.mubr.bf16.vlgmr.msra.gmra.mxu1 %v1117_v38  ;;  %1353 = vmatpush3.bf16.msra.mxu0 %v1477_v41  ;;  %v17_v38 = vld [vmem:[%s1926_s0 + $0x10] sm:$0xff] }
  0x25   :  { %1399 = vmatpush3.bf16.msra.mxu1 %v1479_v43  ;;  %1354 = vmatprep.subr.bf16.mxu0 %v1480_v44  ;;  %v1120_v41 = vcombine.high %v17_v38, %v21_v39  ;;  %v25_v43 = vld [vmem:[%s1926_s0 + $0x50] sm:$0xff] }
  0x26   :  { %798 = vmatprep.mubr.bf16.mxu0 %v1124_v48  ;;  %870 = vmatprep.mubr.bf16.mxu1 %v1126_v52  ;;  %v29_v44 = vld [vmem:[%s1926_s0 + $0x70] sm:$0xff]  ;;  %v30_v48 = vld [vmem:[%s1926_s0 + $0x78] sm:$0xff] }
  0x27   :  { %1400 = vmatprep.subr.bf16.mxu1 %v1482_v53  ;;  %v1128_v50 = vcombine.high %v25_v43, %v29_v44  ;;  %v33_v52 = vld [vmem:[%s1926_s0 + $0x90] sm:$0xff] }
  0x28   :  { %1355 = vmatpush3.bf16.msra.mxu0 %v1481_v45  ;;  %v1119_v45 = vcombine.low %v17_v38, %v21_v39  ;;  %v37_v53 = vld [vmem:[%s1926_s0 + $0xb0] sm:$0xff] }
  0x29   :  { %1401 = vmatpush3.bf16.msra.mxu1 %v1483_v55  ;;  %1356 = vmatprep.subr.bf16.mxu0 %v1484_v56  ;;  %v38_v55 = vld [vmem:[%s1926_s0 + $0xb8] sm:$0xff]  ;;  %v1127_v56 = vcombine.low %v25_v43, %v29_v44 }
  0x2a   :  { %1402 = vmatprep.subr.bf16.mxu1 %v1486_v58  ;;  %v1136_v58 = vcombine.high %v33_v52, %v37_v53 }
  0x2b   :  { %799 = vmatmul.mubr.bf16.gmra.mxu0 %v1123_v51  ;;  %v1130_v51 = vcombine.high %v26_v47, %v30_v48 }
  0x2c   :  { %871 = vmatmul.mubr.bf16.gmra.mxu1 %v1125_v54  ;;  %1357 = vmatpush3.bf16.msra.mxu0 %v1485_v57  ;;  %v34_v54 = vld [vmem:[%s1926_s0 + $0x98] sm:$0xff]  ;;  %v1129_v57 = vcombine.low %v26_v47, %v30_v48 }
  0x2d   :  { %1403 = vmatpush3.bf16.msra.mxu1 %v1487_v59  ;;  %806 = vmatprep.mubr.bf16.mxu0 %v1132_v0  ;;  %v1138_v59 = vcombine.high %v34_v54, %v38_v55  ;;  %v1135_v0 = vcombine.low %v33_v52, %v37_v53 }
  0x2e   :  { %878 = vmatprep.mubr.bf16.mxu1 %v1134_v1  ;;  %1358 = vmatprep.subr.bf16.mxu0 %v1488_v2  ;;  %v1137_v1 = vcombine.low %v34_v54, %v38_v55  ;;  %v1144_v2 = vcombine.high %v41_v60, %v45_v61 }
  0x2f   :  { %1404 = vmatprep.subr.bf16.mxu1 %v1490_v6  ;;  %v1143_v6 = vcombine.low %v41_v60, %v45_v61 }
  0x30   :  { %1359 = vmatpush3.bf16.msra.mxu0 %v1489_v5  ;;  %v50_v5 = vld [vmem:[%s1926_s0 + $0x118] sm:$0xff] }
  0x31   :  { %1405 = vmatpush3.bf16.msra.mxu1 %v1491_v7  ;;  %1360 = vmatprep.subr.bf16.mxu0 %v1492_v8  ;;  %v1145_v7 = vcombine.low %v42_v62, %v46_v63  ;;  %v1153_v11 = vcombine.low %v50_v5, %v50_v5 }
  0x32   :  { %1406 = vmatprep.subr.bf16.mxu1 %v1494_v10 }
  0x33   :  { %807 = vmatmul.mubr.bf16.gmra.mxu0 %v1131_v3  ;;  %v1146_v3 = vcombine.high %v42_v62, %v46_v63 }
  0x34   :  { %879 = vmatmul.mubr.bf16.gmra.mxu1 %v1133_v4  ;;  %1361 = vmatpush3.bf16.msra.mxu0 %v1493_v9  ;;  %v49_v4 = vld [vmem:[%s1926_s0 + $0x110] sm:$0xff]  ;;  %v1154_v9 = vcombine.high %v50_v5, %v50_v5 }
  0x35   :  { %814 = vmatprep.mubr.bf16.mxu0 %v1140_v14  ;;  %886 = vmatprep.mubr.bf16.mxu1 %v1142_v17  ;;  %v1152_v8 = vcombine.high %v49_v4, %v49_v4  ;;  %v1151_v10 = vcombine.low %v49_v4, %v49_v4 }
  0x36   :  { %1407 = vmatpush3.bf16.msra.mxu1 %v1495_v18  ;;  %1362 = vmatprep.subr.bf16.mxu0 %v1496_v20 }
  0x37   :  { %1408 = vmatprep.subr.bf16.mxu1 %v1498_v22 }
  0x38   :  { %1363 = vmatpush3.bf16.msra.mxu0 %v1497_v21 }
  0x39   :  { %1364 = vmatprep.subr.bf16.mxu0 %v1500_v24 }
  0x3a   :  { %1409 = vmatpush3.bf16.msra.mxu1 %v1499_v23 }
  0x3b   :  { %815 = vmatmul.mubr.bf16.gmra.mxu0 %v1139_v16  ;;  %1410 = vmatprep.subr.bf16.mxu1 %v1506_v31 }
  0x3c   :  { %887 = vmatmul.mubr.bf16.gmra.mxu1 %v1141_v19  ;;  %822 = vmatprep.mubr.bf16.mxu0 %v1148_v27 }
  0x3d   :  { %894 = vmatprep.mubr.bf16.mxu1 %v1150_v28  ;;  %1365 = vmatpush3.bf16.msra.mxu0 %v1503_v29 }
  0x3e   :  { %1411 = vmatpush3.bf16.msra.mxu1 %v1507_v33  ;;  %1366 = vmatprep.subr.bf16.mxu0 %v1508_v34 }
  0x3f   :  { %1412 = vmatprep.subr.bf16.mxu1 %v1510_v36 }
  0x41   :  { %1367 = vmatpush3.bf16.msra.mxu0 %v1509_v35 }
  0x42   :  { %1413 = vmatpush3.bf16.msra.mxu1 %v1511_v37 }
  0x43   :  { %823 = vmatmul.mubr.bf16.gmra.mxu0 %v1147_v30 }
  0x44   :  { %895 = vmatmul.mubr.bf16.gmra.mxu1 %v1149_v32  ;;  %934 = vmatprep.mubr.bf16.mxu0 %v1120_v41 }
  0x45   :  { %1006 = vmatprep.mubr.bf16.mxu1 %v1122_v46 }
  0x4b   :  { %935 = vmatmul.mubr.bf16.vlgmr.msra.gmra.mxu0 %v1119_v45 }
  0x4c   :  { %1007 = vmatmul.mubr.bf16.vlgmr.msra.gmra.mxu1 %v1121_v49  ;;  %942 = vmatprep.mubr.bf16.mxu0 %v1128_v50  ;;  %v1879_v49 = vld [vmem:[%s1927_s2] ss:$0 sm:$0xff] }
  0x4d   :  { %1014 = vmatprep.mubr.bf16.mxu1 %v1130_v51 }
  0x53   :  { %943 = vmatmul.mubr.bf16.gmra.mxu0 %v1127_v56 }
  0x54   :  { %1015 = vmatmul.mubr.bf16.gmra.mxu1 %v1129_v57  ;;  %950 = vmatprep.mubr.bf16.mxu0 %v1136_v58 }
  0x55   :  { %1022 = vmatprep.mubr.bf16.mxu1 %v1138_v59 }
  0x5b   :  { %951 = vmatmul.mubr.bf16.gmra.mxu0 %v1135_v0 }
  0x5c   :  { %1023 = vmatmul.mubr.bf16.gmra.mxu1 %v1137_v1  ;;  %958 = vmatprep.mubr.bf16.mxu0 %v1144_v2 }
  0x5d   :  { %1030 = vmatprep.mubr.bf16.mxu1 %v1146_v3 }
  0x63   :  { %959 = vmatmul.mubr.bf16.gmra.mxu0 %v1143_v6 }
  0x64   :  { %1031 = vmatmul.mubr.bf16.gmra.mxu1 %v1145_v7  ;;  %966 = vmatprep.mubr.bf16.mxu0 %v1152_v8 }
  0x65   :  { %1038 = vmatprep.mubr.bf16.mxu1 %v1154_v9 }
  0x6b   :  { %967 = vmatmul.mubr.bf16.gmra.mxu0 %v1151_v10 }
  0x6c   :  { %1039 = vmatmul.mubr.bf16.gmra.mxu1 %v1153_v11 }
  0xe3   :  { %v1276_v12 = vpop.f32.mrf.mxu0 }
  0xe4   :  { %v1322_v13 = vpop.f32.mrf.mxu1 }
  0xe5   :  { %v1277_v14 = vpop.f32.mrf.mxu0 }
  0xe6   :  { %v1323_v15 = vpop.f32.mrf.mxu1  ;;  %v1278_v47 = vadd.f32 %v1277_v14, %v1276_v12 }
  0xe7   :  { %v1279_v16 = vpop.f32.mrf.mxu0  ;;  %v1324_v57 = vadd.f32 %v1323_v15, %v1322_v13 }
  0xe8   :  { %v1325_v17 = vpop.f32.mrf.mxu1  ;;  %v793_v53 = vadd.f32 %v1278_v47, %v1879_v49 }
  0xe9   :  { %v1280_v18 = vpop.f32.mrf.mxu0 }
  0xea   :  { %v1326_v19 = vpop.f32.mrf.mxu1  ;;  %v1281_v54 = vadd.f32 %v1280_v18, %v1279_v16  ;;  %v865_v60 = vadd.f32 %v1324_v57, %v793_v53 }
  0xeb   :  { %v1282_v20 = vpop.f32.mrf.mxu0  ;;  %v1327_v2 = vadd.f32 %v1326_v19, %v1325_v17 }
  0xec   :  { %v1328_v21 = vpop.f32.mrf.mxu1  ;;  %v796_v61 = vadd.f32 %v1281_v54, %v1879_v49 }
  0xed   :  { %v1283_v22 = vpop.f32.mrf.mxu0 }
  0xee   :  { %v1329_v23 = vpop.f32.mrf.mxu1  ;;  %v1284_v62 = vadd.f32 %v1283_v22, %v1282_v20  ;;  %v868_v8 = vadd.f32 %v1327_v2, %v796_v61 }
  0xef   :  { %v1285_v24 = vpop.f32.mrf.mxu0  ;;  %v1330_v14 = vadd.f32 %v1329_v23, %v1328_v21 }
  0xf0   :  { %v1836_v25 = vpop.f32.mrf.mxu1  ;;  %v801_v9 = vadd.f32 %v1284_v62, %v1879_v49 }
  0xf1   :  { %v1286_v26 = vpop.f32.mrf.mxu0 }
  0xf2   :  { %v1838_v27 = vpop.f32.mrf.mxu1  ;;  %v1287_v6 = vadd.f32 %v1286_v26, %v1285_v24  ;;  %v873_v19 = vadd.f32 %v1330_v14, %v801_v9 }
  0xf3   :  { %v1288_v28 = vpop.f32.mrf.mxu0 }
  0xf4   :  { %v1840_v29 = vpop.f32.mrf.mxu1  ;;  %v804_v20 = vadd.f32 %v1287_v6, %v1879_v49 }
  0xf5   :  { %v1289_v30 = vpop.f32.mrf.mxu0 }
  0xf6   :  { %v1842_v31 = vpop.f32.mrf.mxu1  ;;  %v1290_v22 = vadd.f32 %v1289_v30, %v1288_v28 }
  0xf7   :  { %v1844_v32 = vpop.f32.mrf.mxu0 }
  0xf8   :  { %v1846_v33 = vpop.f32.mrf.mxu1 }
  0xf9   :  { %v1848_v34 = vpop.f32.mrf.mxu0 }
  0xfa   :  { %v1850_v35 = vpop.f32.mrf.mxu1  ;;  %v1293_v28 = vadd.f32 %v1848_v34, %v1844_v32 }
  0xfb   :  { %v1852_v36 = vpop.f32.mrf.mxu0 }
  0xfc   :  { %v1854_v37 = vpop.f32.mrf.mxu1  ;;  %v812_v2 = vadd.f32 %v1293_v28, %v1879_v49 }
  0xfd   :  { %v1856_v38 = vpop.f32.mrf.mxu0 }
  0xfe   :  { %v1858_v39 = vpop.f32.mrf.mxu1 }
  0xff   :  { %v1860_v40 = vpop.f32.mrf.mxu0 }
 0x100   :  { %v1862_v41 = vpop.f32.mrf.mxu1 }
 0x101   :  { %v1864_v42 = vpop.f32.mrf.mxu0 }
 0x102   :  { %v1866_v43 = vpop.f32.mrf.mxu1 }
 0x103   :  { %v1868_v44 = vpop.f32.mrf.mxu0 }
 0x104   :  { %v1870_v45 = vpop.f32.mrf.mxu1 }
 0x105   :  { %v1872_v46 = vpop.f32.mrf.mxu0 }
 0x106   :  { %v1874_v48 = vpop.f32.mrf.mxu1 }
 0x107   :  { %v1303_v50 = vpop.f32.mrf.mxu0 }
 0x108   :  { %v1349_v51 = vpop.f32.mrf.mxu1 }
 0x109   :  { %v1304_v52 = vpop.f32.mrf.mxu0  ;;  %v1333_v51 = vadd.f32 %v1838_v27, %v1836_v25  ;;  %v1336_v25 = vadd.f32 %v1842_v31, %v1840_v29  ;;  %v1339_v29 = vadd.f32 %v1850_v35, %v1846_v33  ;;  %v1342_v33 = vadd.f32 %v1858_v39, %v1854_v37 }
 0x10a   :  { %v1350_v55 = vpop.f32.mrf.mxu1  ;;  %v1345_v37 = vadd.f32 %v1866_v43, %v1862_v41 }
 0x10b   :  { %v1368_v56 = vpop.f32.mrf.mxu0  ;;  %v876_v23 = vadd.f32 %v1333_v51, %v804_v20 }
 0x10c   :  { %v1414_v58 = vpop.f32.mrf.mxu1 }
 0x10d   :  { %v1369_v59 = vpop.f32.mrf.mxu0 }
 0x10e   :  { %v1370_v63 = vadd.f32 %v1369_v59, %v1368_v56  ;;  %v1415_v0 = vpop.f32.mrf.mxu1  ;;  %v809_v56 = vadd.f32 %v1290_v22, %v1879_v49 }
 0x10f   :  { %v1371_v1 = vpop.f32.mrf.mxu0  ;;  %v1416_v4 = vadd.f32 %v1415_v0, %v1414_v58 }
 0x110   :  { %v937_v3 = vadd.f32 %v1370_v63, %v865_v60  ;;  %v1417_v5 = vpop.f32.mrf.mxu1  ;;  %v881_v34 = vadd.f32 %v1336_v25, %v809_v56 }
 0x111   :  { %v1372_v7 = vpop.f32.mrf.mxu0 }
 0x112   :  { %v1009_v10 = vadd.f32 %v1416_v4, %v937_v3  ;;  %v1373_v11 = vadd.f32 %v1372_v7, %v1371_v1  ;;  %v1418_v12 = vpop.f32.mrf.mxu1  ;;  %v1296_v3 = vadd.f32 %v1856_v38, %v1852_v36  ;;  %v1299_v38 = vadd.f32 %v1864_v42, %v1860_v40 }
 0x113   :  { %v1374_v13 = vpop.f32.mrf.mxu0  ;;  %v1419_v16 = vadd.f32 %v1418_v12, %v1417_v5  ;;  %v884_v12 = vadd.f32 %v1339_v29, %v812_v2 }
 0x114   :  { %v940_v15 = vadd.f32 %v1373_v11, %v868_v8  ;;  %v1420_v18 = vpop.f32.mrf.mxu1  ;;  %v1046_v47 = vmul.f32 0.2, %v1009_v10  ;;  %v817_v36 = vadd.f32 %v1296_v3, %v1879_v49 }
 0x115   :  { %v1375_v17 = vpop.f32.mrf.mxu0 }
 0x116   :  { %v1012_v50 = vadd.f32 %v1419_v16, %v940_v15  ;;  %v1376_v24 = vadd.f32 %v1375_v17, %v1374_v13  ;;  %v1421_v26 = vpop.f32.mrf.mxu1  ;;  %v1055_v57 = vmax.f32 %v1009_v10, %v1046_v47  ;;  %v889_v42 = vadd.f32 %v1342_v33, %v817_v36 }
 0x117   :  { %v1377_v52 = vpop.f32.mrf.mxu0  ;;  %v1422_v55 = vadd.f32 %v1421_v26, %v1420_v18 }
 0x118   :  { %v1047_v53 = vmul.f32 0.2, %v1012_v50  ;;  %v945_v54 = vadd.f32 %v1376_v24, %v873_v19  ;;  %v1423_v21 = vpop.f32.mrf.mxu1  ;;  %v1302_v24 = vadd.f32 %v1872_v46, %v1868_v44 }
 0x119   :  { %v1378_v30 = vpop.f32.mrf.mxu0 }
 0x11a   :  { %v1056_v58 = vmax.f32 %v1012_v50, %v1047_v53  ;;  %v1017_v59 = vadd.f32 %v1422_v55, %v945_v54  ;;  %v1379_v60 = vadd.f32 %v1378_v30, %v1377_v52  ;;  %v1424_v61 = vpop.f32.mrf.mxu1  ;;  %v820_v50 = vadd.f32 %v1299_v38, %v1879_v49 }
 0x11b   :  { %v1380_v62 = vpop.f32.mrf.mxu0  ;;  %v1425_v0 = vadd.f32 %v1424_v61, %v1423_v21  ;;  %v825_v44 = vadd.f32 %v1302_v24, %v1879_v49  ;;  %v1348_v61 = vadd.f32 %v1874_v48, %v1870_v45 }
 0x11c   :  { %v1240_v27 = vpack.c.bf16 %v1056_v58, %v1055_v57  ;;  %v948_v63 = vadd.f32 %v1379_v60, %v876_v23  ;;  %v1426_v1 = vpop.f32.mrf.mxu1  ;;  %v1048_v4 = vmul.f32 0.2, %v1017_v59  ;;  %v892_v56 = vadd.f32 %v1345_v37, %v820_v50 }
 0x11d   :  { %v1381_v32 = vpop.f32.mrf.mxu0 }
 0x11e   :  { %1241 = vst [vmem:[%s1928_s3] sm:$0xff] %v1240_v27   ;;  %v1020_v5 = vadd.f32 %v1425_v0, %v948_v63  ;;  %v1382_v6 = vadd.f32 %v1381_v32, %v1380_v62  ;;  %v1427_v7 = vpop.f32.mrf.mxu1  ;;  %v1057_v14 = vmax.f32 %v1017_v59, %v1048_v4  ;;  %v897_v63 = vadd.f32 %v1348_v61, %v825_v44 }
 0x11f   :  { %v1383_v31 = vpop.f32.mrf.mxu0  ;;  %v1428_v10 = vadd.f32 %v1427_v7, %v1426_v1 }
 0x120   :  { %v1049_v8 = vmul.f32 0.2, %v1020_v5  ;;  %v953_v9 = vadd.f32 %v1382_v6, %v881_v34  ;;  %v1429_v11 = vpop.f32.mrf.mxu1 }
 0x121   :  { %v1384_v13 = vpop.f32.mrf.mxu0 }
 0x122   :  { %v1058_v15 = vmax.f32 %v1020_v5, %v1049_v8  ;;  %v1025_v16 = vadd.f32 %v1428_v10, %v953_v9  ;;  %v1385_v18 = vadd.f32 %v1384_v13, %v1383_v31  ;;  %v1430_v20 = vpop.f32.mrf.mxu1 }
 0x123   :  { %v1386_v22 = vpop.f32.mrf.mxu0  ;;  %v1431_v19 = vadd.f32 %v1430_v20, %v1429_v11 }
 0x124   :  { %v1245_v35 = vpack.c.bf16 %v1058_v15, %v1057_v14  ;;  %v956_v17 = vadd.f32 %v1385_v18, %v884_v12  ;;  %v1432_v47 = vpop.f32.mrf.mxu1  ;;  %v1050_v26 = vmul.f32 0.2, %v1025_v16 }
 0x125   :  { %v1387_v40 = vpop.f32.mrf.mxu0 }
 0x126   :  { %1257 = vst [vmem:[%s1928_s3 + $0x8] sm:$0xff] %v1245_v35   ;;  %v1028_v51 = vadd.f32 %v1431_v19, %v956_v17  ;;  %v1388_v52 = vadd.f32 %v1387_v40, %v1386_v22  ;;  %v1433_v53 = vpop.f32.mrf.mxu1  ;;  %v1059_v28 = vmax.f32 %v1025_v16, %v1050_v26 }
 0x127   :  { %v1389_v39 = vpop.f32.mrf.mxu0  ;;  %v1434_v21 = vadd.f32 %v1433_v53, %v1432_v47 }
 0x128   :  { %v1051_v54 = vmul.f32 0.2, %v1028_v51  ;;  %v961_v55 = vadd.f32 %v1388_v52, %v889_v42  ;;  %v1435_v23 = vpop.f32.mrf.mxu1 }
 0x129   :  { %v1390_v46 = vpop.f32.mrf.mxu0 }
 0x12a   :  { %v1060_v30 = vmax.f32 %v1028_v51, %v1051_v54  ;;  %v1033_v57 = vadd.f32 %v1434_v21, %v961_v55  ;;  %v1391_v58 = vadd.f32 %v1390_v46, %v1389_v39  ;;  %v1436_v59 = vpop.f32.mrf.mxu1 }
 0x12b   :  { %v1392_v60 = vpop.f32.mrf.mxu0  ;;  %v1437_v43 = vadd.f32 %v1436_v59, %v1435_v23 }
 0x12c   :  { %v1250_v62 = vpack.c.bf16 %v1060_v30, %v1059_v28  ;;  %v964_v41 = vadd.f32 %v1391_v58, %v892_v56  ;;  %v1438_v25 = vpop.f32.mrf.mxu1  ;;  %v1052_v49 = vmul.f32 0.2, %v1033_v57 }
 0x12d   :  { %v1393_v27 = vpop.f32.mrf.mxu0 }
 0x12e   :  { %1258 = vst [vmem:[%s1928_s3 + $0x10] sm:$0xff] %v1250_v62   ;;  %v1036_v0 = vadd.f32 %v1437_v43, %v964_v41  ;;  %v1394_v1 = vadd.f32 %v1393_v27, %v1392_v60  ;;  %v1439_v2 = vpop.f32.mrf.mxu1  ;;  %v1061_v48 = vmax.f32 %v1033_v57, %v1052_v49 }
 0x12f   :  { %v1395_v3 = vpop.f32.mrf.mxu0  ;;  %v1440_v4 = vadd.f32 %v1439_v2, %v1438_v25 }
 0x130   :  { %v1053_v32 = vmul.f32 0.2, %v1036_v0  ;;  %v969_v34 = vadd.f32 %v1394_v1, %v897_v63  ;;  %v1441_v5 = vpop.f32.mrf.mxu1 }
 0x131   :  { %v1396_v45 = vpop.f32.mrf.mxu0 }
 0x132   :  { %v1062_v6 = vmax.f32 %v1036_v0, %v1053_v32  ;;  %v1041_v7 = vadd.f32 %v1440_v4, %v969_v34  ;;  %v1442_v29 = vpop.f32.mrf.mxu1 }
 0x134   :  { %v1255_v31 = vpack.c.bf16 %v1062_v6, %v1061_v48  ;;  %v1054_v8 = vmul.f32 0.2, %v1041_v7 }
 0x136   :  { %1259 = vst [vmem:[%s1928_s3 + $0x18] sm:$0xff] %v1255_v31   ;;  %v1063_v9 = vmax.f32 %v1041_v7, %v1054_v8 }
 0x138   :  { %v1236_v10 = vpack.c.bf16 %v1063_v9, %v1063_v9 }
 0x13a   :  { %1109 = vst [vmem:[%s1928_s3 + $0x20] sm:$0xf] %v1236_v10 }

// kernel: ssrtvd_d_t_forward.5
= control target key start
LH: loop header
LB: loop body
LE: loop exit
PB: predicated region body
PF: predicated region fallthrough
CT: control target
= control target key end

     0   :  { %s3789_s1 = inlined_call_operand.vmem [shape: bf16[2048,256], index: 1, kind: input, shape index: {}]   ;;  %s3790_s0 = inlined_call_operand.vmem [shape: bf16[8,2048], index: 0, kind: input, shape index: {}]   ;;  %s3791_s2 = inlined_call_operand.vmem [shape: f32[1,256], index: 2, kind: input, shape index: {}]   ;;  %s3792_s3 = inlined_call_operand.vmem [shape: bf16[256,128], index: 3, kind: input, shape index: {}]   ;;  %s3793_s4 = inlined_call_operand.vmem [shape: f32[1,128], index: 4, kind: input, shape index: {}]   ;;  %s3794_s5 = inlined_call_operand.vmem [shape: f32[8,128], index: 5, kind: output, shape index: {}]  }
   0x1   :  { %v2458_v0 = vld [vmem:[%s3789_s1 + $0x74] ss:$8 sps:$4 sm:$0xff]   ;;  %v2462_v2 = vld [vmem:[%s3789_s1 + $0x70] ss:$8 sps:$4 sm:$0xff]   ;;  %v2464_v4 = vld [vmem:[%s3789_s1 + $0x64] ss:$8 sps:$4 sm:$0xff]  }
   0x2   :  { %v2460_v1 = vld [vmem:[%s3789_s1 + $0x174] ss:$8 sps:$4 sm:$0xff]   ;;  %1633 = vmatprep.subr.bf16.mxu0 %v2458_v0  ;;  %v2463_v3 = vld [vmem:[%s3789_s1 + $0x170] ss:$8 sps:$4 sm:$0xff]   ;;  %v2466_v5 = vld [vmem:[%s3789_s1 + $0x164] ss:$8 sps:$4 sm:$0xff]  }
   0x3   :  { %1674 = vmatprep.subr.bf16.mxu1 %v2460_v1  ;;  %1634 = vmatpush1.bf16.msra.mxu0 %v2462_v2  ;;  %v2468_v6 = vld [vmem:[%s3789_s1 + $0x60] ss:$8 sps:$4 sm:$0xff]   ;;  %v2470_v8 = vld [vmem:[%s3789_s1 + $0x54] ss:$8 sps:$4 sm:$0xff]   ;;  %v2474_v10 = vld [vmem:[%s3789_s1 + $0x50] ss:$8 sps:$4 sm:$0xff]  }
   0x4   :  { %1675 = vmatpush1.bf16.msra.mxu1 %v2463_v3  ;;  %1635 = vmatprep.subr.bf16.mxu0 %v2464_v4  ;;  %v2469_v7 = vld [vmem:[%s3789_s1 + $0x160] ss:$8 sps:$4 sm:$0xff]   ;;  %v2472_v9 = vld [vmem:[%s3789_s1 + $0x154] ss:$8 sps:$4 sm:$0xff]   ;;  %v2475_v11 = vld [vmem:[%s3789_s1 + $0x150] ss:$8 sps:$4 sm:$0xff]  }
   0x5   :  { %1676 = vmatprep.subr.bf16.mxu1 %v2466_v5  ;;  %v2476_v12 = vld [vmem:[%s3789_s1 + $0x44] ss:$8 sps:$4 sm:$0xff]   ;;  %v2480_v14 = vld [vmem:[%s3789_s1 + $0x40] ss:$8 sps:$4 sm:$0xff]   ;;  %v2482_v16 = vld [vmem:[%s3789_s1 + $0x34] ss:$8 sps:$4 sm:$0xff]  }
   0x6   :  { %v2478_v13 = vld [vmem:[%s3789_s1 + $0x144] ss:$8 sps:$4 sm:$0xff]   ;;  %v2481_v15 = vld [vmem:[%s3789_s1 + $0x140] ss:$8 sps:$4 sm:$0xff]   ;;  %v2484_v17 = vld [vmem:[%s3789_s1 + $0x134] ss:$8 sps:$4 sm:$0xff]  }
   0x7   :  { %1636 = vmatpush1.bf16.msra.mxu0 %v2468_v6  ;;  %v2486_v18 = vld [vmem:[%s3789_s1 + $0x30] ss:$8 sps:$4 sm:$0xff]   ;;  %v2488_v20 = vld [vmem:[%s3789_s1 + $0x24] ss:$8 sps:$4 sm:$0xff]   ;;  %v2492_v22 = vld [vmem:[%s3789_s1 + $0x20] ss:$8 sps:$4 sm:$0xff]  }
   0x8   :  { %1677 = vmatpush1.bf16.msra.mxu1 %v2469_v7  ;;  %1637 = vmatprep.subr.bf16.mxu0 %v2470_v8  ;;  %v2487_v19 = vld [vmem:[%s3789_s1 + $0x130] ss:$8 sps:$4 sm:$0xff]   ;;  %v2490_v21 = vld [vmem:[%s3789_s1 + $0x124] ss:$8 sps:$4 sm:$0xff]   ;;  %v2493_v23 = vld [vmem:[%s3789_s1 + $0x120] ss:$8 sps:$4 sm:$0xff]  }
   0x9   :  { %1678 = vmatprep.subr.bf16.mxu1 %v2472_v9  ;;  %v2494_v24 = vld [vmem:[%s3789_s1 + $0x14] ss:$8 sps:$4 sm:$0xff]   ;;  %v2498_v26 = vld [vmem:[%s3789_s1 + $0x10] ss:$8 sps:$4 sm:$0xff]   ;;  %v2500_v28 = vld [vmem:[%s3789_s1 + $0x4] ss:$8 sps:$4 sm:$0xff]  }
   0xa   :  { %v2496_v25 = vld [vmem:[%s3789_s1 + $0x114] ss:$8 sps:$4 sm:$0xff]   ;;  %v2499_v27 = vld [vmem:[%s3789_s1 + $0x110] ss:$8 sps:$4 sm:$0xff]   ;;  %v2502_v29 = vld [vmem:[%s3789_s1 + $0x104] ss:$8 sps:$4 sm:$0xff]  }
   0xb   :  { %1638 = vmatpush1.bf16.msra.mxu0 %v2474_v10  ;;  %v2504_v30 = vld [vmem:[%s3789_s1] ss:$8 sps:$4 sm:$0xff]   ;;  %v2506_v32 = vld [vmem:[%s3789_s1 + $0xf4] ss:$8 sps:$4 sm:$0xff]   ;;  %v2510_v34 = vld [vmem:[%s3789_s1 + $0xf0] ss:$8 sps:$4 sm:$0xff]  }
   0xc   :  { %1679 = vmatpush1.bf16.msra.mxu1 %v2475_v11  ;;  %1639 = vmatprep.subr.bf16.mxu0 %v2476_v12  ;;  %v2505_v31 = vld [vmem:[%s3789_s1 + $0x100] ss:$8 sps:$4 sm:$0xff]   ;;  %v2508_v33 = vld [vmem:[%s3789_s1 + $0x1f4] ss:$8 sps:$4 sm:$0xff]   ;;  %v2511_v35 = vld [vmem:[%s3789_s1 + $0x1f0] ss:$8 sps:$4 sm:$0xff]  }
   0xd   :  { %1680 = vmatprep.subr.bf16.mxu1 %v2478_v13  ;;  %v2512_v36 = vld [vmem:[%s3789_s1 + $0xe4] ss:$8 sps:$4 sm:$0xff]   ;;  %v2516_v38 = vld [vmem:[%s3789_s1 + $0xe0] ss:$8 sps:$4 sm:$0xff]   ;;  %v2518_v40 = vld [vmem:[%s3789_s1 + $0xd4] ss:$8 sps:$4 sm:$0xff]  }
   0xe   :  { %v2514_v37 = vld [vmem:[%s3789_s1 + $0x1e4] ss:$8 sps:$4 sm:$0xff]   ;;  %v2517_v39 = vld [vmem:[%s3789_s1 + $0x1e0] ss:$8 sps:$4 sm:$0xff]   ;;  %v2520_v41 = vld [vmem:[%s3789_s1 + $0x1d4] ss:$8 sps:$4 sm:$0xff]  }
   0xf   :  { %1640 = vmatpush1.bf16.msra.mxu0 %v2480_v14  ;;  %v2522_v42 = vld [vmem:[%s3789_s1 + $0xd0] ss:$8 sps:$4 sm:$0xff]   ;;  %v2524_v44 = vld [vmem:[%s3789_s1 + $0xc4] ss:$8 sps:$4 sm:$0xff]   ;;  %v2528_v49 = vld [vmem:[%s3789_s1 + $0xc0] ss:$8 sps:$4 sm:$0xff]  }
  0x10   :  { %1681 = vmatpush1.bf16.msra.mxu1 %v2481_v15  ;;  %1641 = vmatprep.subr.bf16.mxu0 %v2482_v16  ;;  %v2523_v43 = vld [vmem:[%s3789_s1 + $0x1d0] ss:$8 sps:$4 sm:$0xff]   ;;  %v2526_v45 = vld [vmem:[%s3789_s1 + $0x1c4] ss:$8 sps:$4 sm:$0xff]   ;;  %v2529_v50 = vld [vmem:[%s3789_s1 + $0x1c0] ss:$8 sps:$4 sm:$0xff]  }
  0x11   :  { %1682 = vmatprep.subr.bf16.mxu1 %v2484_v17  ;;  %v21_v46 = vld [vmem:[%s3790_s0] sm:$0xff]  ;;  %v22_v48 = vld [vmem:[%s3790_s0 + $0x8] sm:$0xff]  ;;  %v2530_v52 = vld [vmem:[%s3789_s1 + $0xb4] ss:$8 sps:$4 sm:$0xff]  }
  0x12   :  { %v2148_v47 = vcombine.high %v21_v46, %v21_v46  ;;  %v2150_v51 = vcombine.high %v22_v48, %v22_v48  ;;  %v2532_v53 = vld [vmem:[%s3789_s1 + $0x1b4] ss:$8 sps:$4 sm:$0xff]   ;;  %v2534_v54 = vld [vmem:[%s3789_s1 + $0xb0] ss:$8 sps:$4 sm:$0xff]   ;;  %v2536_v56 = vld [vmem:[%s3789_s1 + $0xa4] ss:$8 sps:$4 sm:$0xff]   ;;  %v2147_v6 = vcombine.low %v21_v46, %v21_v46  ;;  %v2149_v7 = vcombine.low %v22_v48, %v22_v48 }
  0x13   :  { %1642 = vmatpush1.bf16.msra.mxu0 %v2486_v18  ;;  %v2535_v55 = vld [vmem:[%s3789_s1 + $0x1b0] ss:$8 sps:$4 sm:$0xff]   ;;  %v2538_v57 = vld [vmem:[%s3789_s1 + $0x1a4] ss:$8 sps:$4 sm:$0xff]   ;;  %v2540_v58 = vld [vmem:[%s3789_s1 + $0xa0] ss:$8 sps:$4 sm:$0xff]  }
  0x14   :  { %1683 = vmatpush1.bf16.msra.mxu1 %v2487_v19  ;;  %1643 = vmatprep.subr.bf16.mxu0 %v2488_v20  ;;  %v2541_v59 = vld [vmem:[%s3789_s1 + $0x1a0] ss:$8 sps:$4 sm:$0xff]   ;;  %v2542_v60 = vld [vmem:[%s3789_s1 + $0x94] ss:$8 sps:$4 sm:$0xff]   ;;  %v2546_v62 = vld [vmem:[%s3789_s1 + $0x90] ss:$8 sps:$4 sm:$0xff]  }
  0x15   :  { %1684 = vmatprep.subr.bf16.mxu1 %v2490_v21  ;;  %1665 = vmatprep.mubr.bf16.mxu0 %v2148_v47  ;;  %v2544_v61 = vld [vmem:[%s3789_s1 + $0x194] ss:$8 sps:$4 sm:$0xff]   ;;  %v2547_v63 = vld [vmem:[%s3789_s1 + $0x190] ss:$8 sps:$4 sm:$0xff]   ;;  %v2548_v0 = vld [vmem:[%s3789_s1 + $0x84] ss:$8 sps:$4 sm:$0xff]  }
  0x16   :  { %1706 = vmatprep.mubr.bf16.mxu1 %v2150_v51  ;;  %v2550_v1 = vld [vmem:[%s3789_s1 + $0x184] ss:$8 sps:$4 sm:$0xff]   ;;  %v2552_v2 = vld [vmem:[%s3789_s1 + $0x80] ss:$8 sps:$4 sm:$0xff]   ;;  %v2560_v4 = vld [vmem:[%s3789_s1 + $0x274] ss:$8 sps:$4 sm:$0xff]  }
  0x17   :  { %1644 = vmatpush1.bf16.msra.mxu0 %v2492_v22  ;;  %v2553_v3 = vld [vmem:[%s3789_s1 + $0x180] ss:$8 sps:$4 sm:$0xff]   ;;  %v2563_v5 = vld [vmem:[%s3789_s1 + $0x374] ss:$8 sps:$4 sm:$0xff]   ;;  %v2558_v8 = vld [vmem:[%s3789_s1 + $0x270] ss:$8 sps:$4 sm:$0xff]  }
  0x18   :  { %1685 = vmatpush1.bf16.msra.mxu1 %v2493_v23  ;;  %1645 = vmatprep.subr.bf16.mxu0 %v2494_v24  ;;  %v2561_v9 = vld [vmem:[%s3789_s1 + $0x370] ss:$8 sps:$4 sm:$0xff]   ;;  %v2566_v10 = vld [vmem:[%s3789_s1 + $0x264] ss:$8 sps:$4 sm:$0xff]   ;;  %v2564_v12 = vld [vmem:[%s3789_s1 + $0x260] ss:$8 sps:$4 sm:$0xff]  }
  0x19   :  { %1686 = vmatprep.subr.bf16.mxu1 %v2496_v25  ;;  %v2569_v11 = vld [vmem:[%s3789_s1 + $0x364] ss:$8 sps:$4 sm:$0xff]   ;;  %v2567_v13 = vld [vmem:[%s3789_s1 + $0x360] ss:$8 sps:$4 sm:$0xff]   ;;  %v2572_v14 = vld [vmem:[%s3789_s1 + $0x254] ss:$8 sps:$4 sm:$0xff]  }
  0x1a   :  { %v2575_v15 = vld [vmem:[%s3789_s1 + $0x354] ss:$8 sps:$4 sm:$0xff]   ;;  %v2570_v16 = vld [vmem:[%s3789_s1 + $0x250] ss:$8 sps:$4 sm:$0xff]   ;;  %v2578_v18 = vld [vmem:[%s3789_s1 + $0x244] ss:$8 sps:$4 sm:$0xff]  }
  0x1b   :  { %1646 = vmatpush1.bf16.msra.mxu0 %v2498_v26  ;;  %v2573_v17 = vld [vmem:[%s3789_s1 + $0x350] ss:$8 sps:$4 sm:$0xff]   ;;  %v2581_v19 = vld [vmem:[%s3789_s1 + $0x344] ss:$8 sps:$4 sm:$0xff]   ;;  %v2576_v20 = vld [vmem:[%s3789_s1 + $0x240] ss:$8 sps:$4 sm:$0xff]  }
  0x1c   :  { %1687 = vmatpush1.bf16.msra.mxu1 %v2499_v27  ;;  %1647 = vmatprep.subr.bf16.mxu0 %v2500_v28  ;;  %v2579_v21 = vld [vmem:[%s3789_s1 + $0x340] ss:$8 sps:$4 sm:$0xff]   ;;  %v2584_v22 = vld [vmem:[%s3789_s1 + $0x234] ss:$8 sps:$4 sm:$0xff]   ;;  %v2582_v24 = vld [vmem:[%s3789_s1 + $0x230] ss:$8 sps:$4 sm:$0xff]  }
  0x1d   :  { %1688 = vmatprep.subr.bf16.mxu1 %v2502_v29  ;;  %v2587_v23 = vld [vmem:[%s3789_s1 + $0x334] ss:$8 sps:$4 sm:$0xff]   ;;  %v2585_v25 = vld [vmem:[%s3789_s1 + $0x330] ss:$8 sps:$4 sm:$0xff]   ;;  %v2590_v26 = vld [vmem:[%s3789_s1 + $0x224] ss:$8 sps:$4 sm:$0xff]  }
  0x1e   :  { %v2593_v27 = vld [vmem:[%s3789_s1 + $0x324] ss:$8 sps:$4 sm:$0xff]   ;;  %v2588_v28 = vld [vmem:[%s3789_s1 + $0x220] ss:$8 sps:$4 sm:$0xff]   ;;  %v2623_v51 = vld [vmem:[%s3789_s1 + $0x3d4] ss:$8 sps:$4 sm:$0xff]  }
  0x1f   :  { %1648 = vmatpush1.bf16.msra.mxu0 %v2504_v30  ;;  %v2591_v29 = vld [vmem:[%s3789_s1 + $0x320] ss:$8 sps:$4 sm:$0xff]   ;;  %v2596_v30 = vld [vmem:[%s3789_s1 + $0x214] ss:$8 sps:$4 sm:$0xff]   ;;  %v2614_v46 = vld [vmem:[%s3789_s1 + $0x2e4] ss:$8 sps:$4 sm:$0xff]  }
  0x20   :  { %1689 = vmatpush1.bf16.msra.mxu1 %v2505_v31  ;;  %1649 = vmatprep.subr.bf16.mxu0 %v2506_v32  ;;  %v2599_v31 = vld [vmem:[%s3789_s1 + $0x314] ss:$8 sps:$4 sm:$0xff]   ;;  %v2617_v47 = vld [vmem:[%s3789_s1 + $0x3e4] ss:$8 sps:$4 sm:$0xff]   ;;  %v2612_v48 = vld [vmem:[%s3789_s1 + $0x2e0] ss:$8 sps:$4 sm:$0xff]  }
  0x21   :  { %1690 = vmatprep.subr.bf16.mxu1 %v2508_v33  ;;  %v3183_v32 = vld [vmem:[%s3790_s0 + $0x10] sm:$0xff]  ;;  %v3188_v33 = vld [vmem:[%s3790_s0 + $0x18] sm:$0xff] }
  0x23   :  { %1650 = vmatpush2.bf16.msra.mxu0 %v2510_v34  ;;  %v2594_v34 = vld [vmem:[%s3789_s1 + $0x210] ss:$8 sps:$4 sm:$0xff]  }
  0x24   :  { %1691 = vmatpush2.bf16.msra.mxu1 %v2511_v35  ;;  %1651 = vmatprep.subr.bf16.mxu0 %v2512_v36  ;;  %v2597_v35 = vld [vmem:[%s3789_s1 + $0x310] ss:$8 sps:$4 sm:$0xff]   ;;  %v2152_v36 = vcombine.high %v3183_v32, %v3183_v32 }
  0x25   :  { %1692 = vmatprep.subr.bf16.mxu1 %v2514_v37  ;;  %v2154_v37 = vcombine.high %v3188_v33, %v3188_v33 }
  0x27   :  { %1652 = vmatpush2.bf16.msra.mxu0 %v2516_v38  ;;  %v2602_v38 = vld [vmem:[%s3789_s1 + $0x204] ss:$8 sps:$4 sm:$0xff]  }
  0x28   :  { %1693 = vmatpush2.bf16.msra.mxu1 %v2517_v39  ;;  %1653 = vmatprep.subr.bf16.mxu0 %v2518_v40  ;;  %v2605_v39 = vld [vmem:[%s3789_s1 + $0x304] ss:$8 sps:$4 sm:$0xff]   ;;  %v2600_v40 = vld [vmem:[%s3789_s1 + $0x200] ss:$8 sps:$4 sm:$0xff]  }
  0x29   :  { %1694 = vmatprep.subr.bf16.mxu1 %v2520_v41  ;;  %v2603_v41 = vld [vmem:[%s3789_s1 + $0x300] ss:$8 sps:$4 sm:$0xff]  }
  0x2b   :  { %1654 = vmatpush2.bf16.msra.mxu0 %v2522_v42  ;;  %v2608_v42 = vld [vmem:[%s3789_s1 + $0x2f4] ss:$8 sps:$4 sm:$0xff]  }
  0x2c   :  { %1695 = vmatpush2.bf16.msra.mxu1 %v2523_v43  ;;  %1655 = vmatprep.subr.bf16.mxu0 %v2524_v44  ;;  %v2611_v43 = vld [vmem:[%s3789_s1 + $0x3f4] ss:$8 sps:$4 sm:$0xff]   ;;  %v2606_v44 = vld [vmem:[%s3789_s1 + $0x2f0] ss:$8 sps:$4 sm:$0xff]  }
  0x2d   :  { %1696 = vmatprep.subr.bf16.mxu1 %v2526_v45  ;;  %v2609_v45 = vld [vmem:[%s3789_s1 + $0x3f0] ss:$8 sps:$4 sm:$0xff]  }
  0x2f   :  { %1656 = vmatpush2.bf16.msra.mxu0 %v2528_v49  ;;  %v2615_v49 = vld [vmem:[%s3789_s1 + $0x3e0] ss:$8 sps:$4 sm:$0xff]  }
  0x30   :  { %1697 = vmatpush2.bf16.msra.mxu1 %v2529_v50  ;;  %1657 = vmatprep.subr.bf16.mxu0 %v2530_v52  ;;  %v2620_v50 = vld [vmem:[%s3789_s1 + $0x2d4] ss:$8 sps:$4 sm:$0xff]   ;;  %v2618_v52 = vld [vmem:[%s3789_s1 + $0x2d0] ss:$8 sps:$4 sm:$0xff]  }
  0x31   :  { %1698 = vmatprep.subr.bf16.mxu1 %v2532_v53  ;;  %v2621_v53 = vld [vmem:[%s3789_s1 + $0x3d0] ss:$8 sps:$4 sm:$0xff]  }
  0x33   :  { %1658 = vmatpush2.bf16.msra.mxu0 %v2534_v54  ;;  %v2626_v54 = vld [vmem:[%s3789_s1 + $0x2c4] ss:$8 sps:$4 sm:$0xff]  }
  0x34   :  { %1699 = vmatpush2.bf16.msra.mxu1 %v2535_v55  ;;  %1659 = vmatprep.subr.bf16.mxu0 %v2536_v56  ;;  %v2629_v55 = vld [vmem:[%s3789_s1 + $0x3c4] ss:$8 sps:$4 sm:$0xff]   ;;  %v2624_v56 = vld [vmem:[%s3789_s1 + $0x2c0] ss:$8 sps:$4 sm:$0xff]  }
  0x35   :  { %1700 = vmatprep.subr.bf16.mxu1 %v2538_v57  ;;  %v2627_v57 = vld [vmem:[%s3789_s1 + $0x3c0] ss:$8 sps:$4 sm:$0xff]  }
  0x37   :  { %1660 = vmatpush2.bf16.msra.mxu0 %v2540_v58  ;;  %v2632_v58 = vld [vmem:[%s3789_s1 + $0x2b4] ss:$8 sps:$4 sm:$0xff]  }
  0x38   :  { %1701 = vmatpush2.bf16.msra.mxu1 %v2541_v59  ;;  %1661 = vmatprep.subr.bf16.mxu0 %v2542_v60  ;;  %v2635_v59 = vld [vmem:[%s3789_s1 + $0x3b4] ss:$8 sps:$4 sm:$0xff]   ;;  %v2630_v60 = vld [vmem:[%s3789_s1 + $0x2b0] ss:$8 sps:$4 sm:$0xff]  }
  0x39   :  { %1702 = vmatprep.subr.bf16.mxu1 %v2544_v61  ;;  %v2633_v61 = vld [vmem:[%s3789_s1 + $0x3b0] ss:$8 sps:$4 sm:$0xff]  }
  0x3b   :  { %1662 = vmatpush2.bf16.msra.mxu0 %v2546_v62  ;;  %v2638_v62 = vld [vmem:[%s3789_s1 + $0x2a4] ss:$8 sps:$4 sm:$0xff]  }
  0x3c   :  { %1703 = vmatpush2.bf16.msra.mxu1 %v2547_v63  ;;  %1663 = vmatprep.subr.bf16.mxu0 %v2548_v0  ;;  %v2641_v63 = vld [vmem:[%s3789_s1 + $0x3a4] ss:$8 sps:$4 sm:$0xff]   ;;  %v2636_v0 = vld [vmem:[%s3789_s1 + $0x2a0] ss:$8 sps:$4 sm:$0xff]  }
  0x3d   :  { %1704 = vmatprep.subr.bf16.mxu1 %v2550_v1  ;;  %v2639_v1 = vld [vmem:[%s3789_s1 + $0x3a0] ss:$8 sps:$4 sm:$0xff]  }
  0x3f   :  { %1664 = vmatpush2.bf16.msra.mxu0 %v2552_v2  ;;  %v2644_v2 = vld [vmem:[%s3789_s1 + $0x294] ss:$8 sps:$4 sm:$0xff]  }
  0x40   :  { %1705 = vmatpush2.bf16.msra.mxu1 %v2553_v3  ;;  %1715 = vmatprep.subr.bf16.mxu0 %v2560_v4  ;;  %v2647_v3 = vld [vmem:[%s3789_s1 + $0x394] ss:$8 sps:$4 sm:$0xff]   ;;  %v2642_v4 = vld [vmem:[%s3789_s1 + $0x290] ss:$8 sps:$4 sm:$0xff]  }
  0x41   :  { %1756 = vmatprep.subr.bf16.mxu1 %v2563_v5  ;;  %v2645_v5 = vld [vmem:[%s3789_s1 + $0x390] ss:$8 sps:$4 sm:$0xff]  }
  0x42   :  { %1666 = vmatmul.mubr.bf16.vlgmr.msra.gmra.mxu0 %v2147_v6  ;;  %v2650_v6 = vld [vmem:[%s3789_s1 + $0x284] ss:$8 sps:$4 sm:$0xff]  }
  0x43   :  { %1707 = vmatmul.mubr.bf16.vlgmr.msra.gmra.mxu1 %v2149_v7  ;;  %1716 = vmatpush1.bf16.msra.mxu0 %v2558_v8  ;;  %v2653_v7 = vld [vmem:[%s3789_s1 + $0x384] ss:$8 sps:$4 sm:$0xff]   ;;  %v2648_v8 = vld [vmem:[%s3789_s1 + $0x280] ss:$8 sps:$4 sm:$0xff]  }
  0x44   :  { %1757 = vmatpush1.bf16.msra.mxu1 %v2561_v9  ;;  %1717 = vmatprep.subr.bf16.mxu0 %v2566_v10  ;;  %v2651_v9 = vld [vmem:[%s3789_s1 + $0x380] ss:$8 sps:$4 sm:$0xff]   ;;  %v2660_v10 = vld [vmem:[%s3789_s1 + $0x474] ss:$8 sps:$4 sm:$0xff]  }
  0x45   :  { %1758 = vmatprep.subr.bf16.mxu1 %v2569_v11  ;;  %1747 = vmatprep.mubr.bf16.mxu0 %v2152_v36  ;;  %v2663_v11 = vld [vmem:[%s3789_s1 + $0x574] ss:$8 sps:$4 sm:$0xff]   ;;  %v2690_v36 = vld [vmem:[%s3789_s1 + $0x424] ss:$8 sps:$4 sm:$0xff]  }
  0x46   :  { %1788 = vmatprep.mubr.bf16.mxu1 %v2154_v37  ;;  %v2693_v37 = vld [vmem:[%s3789_s1 + $0x524] ss:$8 sps:$4 sm:$0xff]  }
  0x47   :  { %1718 = vmatpush1.bf16.msra.mxu0 %v2564_v12  ;;  %v2151_v12 = vcombine.low %v3183_v32, %v3183_v32  ;;  %v2684_v32 = vld [vmem:[%s3789_s1 + $0x434] ss:$8 sps:$4 sm:$0xff]  }
  0x48   :  { %1759 = vmatpush1.bf16.msra.mxu1 %v2567_v13  ;;  %1719 = vmatprep.subr.bf16.mxu0 %v2572_v14  ;;  %v2153_v13 = vcombine.low %v3188_v33, %v3188_v33  ;;  %v2658_v14 = vld [vmem:[%s3789_s1 + $0x470] ss:$8 sps:$4 sm:$0xff]   ;;  %v2687_v33 = vld [vmem:[%s3789_s1 + $0x534] ss:$8 sps:$4 sm:$0xff]  }
  0x49   :  { %1760 = vmatprep.subr.bf16.mxu1 %v2575_v15  ;;  %v2661_v15 = vld [vmem:[%s3789_s1 + $0x570] ss:$8 sps:$4 sm:$0xff]  }
  0x4b   :  { %1720 = vmatpush1.bf16.msra.mxu0 %v2570_v16  ;;  %v2666_v16 = vld [vmem:[%s3789_s1 + $0x464] ss:$8 sps:$4 sm:$0xff]  }
  0x4c   :  { %1761 = vmatpush1.bf16.msra.mxu1 %v2573_v17  ;;  %1721 = vmatprep.subr.bf16.mxu0 %v2578_v18  ;;  %v2669_v17 = vld [vmem:[%s3789_s1 + $0x564] ss:$8 sps:$4 sm:$0xff]  }
  0x4d   :  { %1762 = vmatprep.subr.bf16.mxu1 %v2581_v19  ;;  %v3333_v18 = vld [vmem:[%s3790_s0 + $0x20] sm:$0xff]  ;;  %v3338_v19 = vld [vmem:[%s3790_s0 + $0x28] sm:$0xff] }
  0x4f   :  { %1722 = vmatpush1.bf16.msra.mxu0 %v2576_v20  ;;  %v2156_v20 = vcombine.high %v3333_v18, %v3333_v18 }
  0x50   :  { %1763 = vmatpush1.bf16.msra.mxu1 %v2579_v21  ;;  %1723 = vmatprep.subr.bf16.mxu0 %v2584_v22  ;;  %v2158_v21 = vcombine.high %v3338_v19, %v3338_v19  ;;  %v2664_v22 = vld [vmem:[%s3789_s1 + $0x460] ss:$8 sps:$4 sm:$0xff]  }
  0x51   :  { %1764 = vmatprep.subr.bf16.mxu1 %v2587_v23  ;;  %v2667_v23 = vld [vmem:[%s3789_s1 + $0x560] ss:$8 sps:$4 sm:$0xff]  }
  0x53   :  { %1724 = vmatpush1.bf16.msra.mxu0 %v2582_v24  ;;  %v2672_v24 = vld [vmem:[%s3789_s1 + $0x454] ss:$8 sps:$4 sm:$0xff]  }
  0x54   :  { %1765 = vmatpush1.bf16.msra.mxu1 %v2585_v25  ;;  %1725 = vmatprep.subr.bf16.mxu0 %v2590_v26  ;;  %v2675_v25 = vld [vmem:[%s3789_s1 + $0x554] ss:$8 sps:$4 sm:$0xff]   ;;  %v2670_v26 = vld [vmem:[%s3789_s1 + $0x450] ss:$8 sps:$4 sm:$0xff]  }
  0x55   :  { %1766 = vmatprep.subr.bf16.mxu1 %v2593_v27  ;;  %v2673_v27 = vld [vmem:[%s3789_s1 + $0x550] ss:$8 sps:$4 sm:$0xff]  }
  0x57   :  { %1726 = vmatpush1.bf16.msra.mxu0 %v2588_v28  ;;  %v2678_v28 = vld [vmem:[%s3789_s1 + $0x444] ss:$8 sps:$4 sm:$0xff]  }
  0x58   :  { %1767 = vmatpush1.bf16.msra.mxu1 %v2591_v29  ;;  %1727 = vmatprep.subr.bf16.mxu0 %v2596_v30  ;;  %v2681_v29 = vld [vmem:[%s3789_s1 + $0x544] ss:$8 sps:$4 sm:$0xff]   ;;  %v2676_v30 = vld [vmem:[%s3789_s1 + $0x440] ss:$8 sps:$4 sm:$0xff]  }
  0x59   :  { %1768 = vmatprep.subr.bf16.mxu1 %v2599_v31  ;;  %v2679_v31 = vld [vmem:[%s3789_s1 + $0x540] ss:$8 sps:$4 sm:$0xff]  }
  0x5b   :  { %1728 = vmatpush1.bf16.msra.mxu0 %v2594_v34  ;;  %v2682_v34 = vld [vmem:[%s3789_s1 + $0x430] ss:$8 sps:$4 sm:$0xff]  }
  0x5c   :  { %1769 = vmatpush1.bf16.msra.mxu1 %v2597_v35  ;;  %1729 = vmatprep.subr.bf16.mxu0 %v2602_v38  ;;  %v2685_v35 = vld [vmem:[%s3789_s1 + $0x530] ss:$8 sps:$4 sm:$0xff]   ;;  %v2688_v38 = vld [vmem:[%s3789_s1 + $0x420] ss:$8 sps:$4 sm:$0xff]  }
  0x5d   :  { %1770 = vmatprep.subr.bf16.mxu1 %v2605_v39  ;;  %v2691_v39 = vld [vmem:[%s3789_s1 + $0x520] ss:$8 sps:$4 sm:$0xff]  }
  0x5f   :  { %1730 = vmatpush1.bf16.msra.mxu0 %v2600_v40  ;;  %v2696_v40 = vld [vmem:[%s3789_s1 + $0x414] ss:$8 sps:$4 sm:$0xff]  }
  0x60   :  { %1771 = vmatpush1.bf16.msra.mxu1 %v2603_v41  ;;  %1731 = vmatprep.subr.bf16.mxu0 %v2608_v42  ;;  %v2699_v41 = vld [vmem:[%s3789_s1 + $0x514] ss:$8 sps:$4 sm:$0xff]   ;;  %v2694_v42 = vld [vmem:[%s3789_s1 + $0x410] ss:$8 sps:$4 sm:$0xff]  }
  0x61   :  { %1772 = vmatprep.subr.bf16.mxu1 %v2611_v43  ;;  %v2697_v43 = vld [vmem:[%s3789_s1 + $0x510] ss:$8 sps:$4 sm:$0xff]  }
  0x63   :  { %1732 = vmatpush2.bf16.msra.mxu0 %v2606_v44  ;;  %v2702_v44 = vld [vmem:[%s3789_s1 + $0x404] ss:$8 sps:$4 sm:$0xff]  }
  0x64   :  { %1773 = vmatpush2.bf16.msra.mxu1 %v2609_v45  ;;  %1733 = vmatprep.subr.bf16.mxu0 %v2614_v46  ;;  %v2705_v45 = vld [vmem:[%s3789_s1 + $0x504] ss:$8 sps:$4 sm:$0xff]   ;;  %v2700_v46 = vld [vmem:[%s3789_s1 + $0x400] ss:$8 sps:$4 sm:$0xff]  }
  0x65   :  { %1774 = vmatprep.subr.bf16.mxu1 %v2617_v47  ;;  %v2703_v47 = vld [vmem:[%s3789_s1 + $0x500] ss:$8 sps:$4 sm:$0xff]  }
  0x67   :  { %1734 = vmatpush2.bf16.msra.mxu0 %v2612_v48  ;;  %v2708_v48 = vld [vmem:[%s3789_s1 + $0x4f4] ss:$8 sps:$4 sm:$0xff]  }
  0x68   :  { %1775 = vmatpush2.bf16.msra.mxu1 %v2615_v49  ;;  %1735 = vmatprep.subr.bf16.mxu0 %v2620_v50  ;;  %v2711_v49 = vld [vmem:[%s3789_s1 + $0x5f4] ss:$8 sps:$4 sm:$0xff]   ;;  %v2706_v50 = vld [vmem:[%s3789_s1 + $0x4f0] ss:$8 sps:$4 sm:$0xff]  }
  0x69   :  { %1776 = vmatprep.subr.bf16.mxu1 %v2623_v51  ;;  %v2709_v51 = vld [vmem:[%s3789_s1 + $0x5f0] ss:$8 sps:$4 sm:$0xff]  }
  0x6b   :  { %1736 = vmatpush2.bf16.msra.mxu0 %v2618_v52  ;;  %v2714_v52 = vld [vmem:[%s3789_s1 + $0x4e4] ss:$8 sps:$4 sm:$0xff]  }
  0x6c   :  { %1777 = vmatpush2.bf16.msra.mxu1 %v2621_v53  ;;  %1737 = vmatprep.subr.bf16.mxu0 %v2626_v54  ;;  %v2717_v53 = vld [vmem:[%s3789_s1 + $0x5e4] ss:$8 sps:$4 sm:$0xff]   ;;  %v2712_v54 = vld [vmem:[%s3789_s1 + $0x4e0] ss:$8 sps:$4 sm:$0xff]  }
  0x6d   :  { %1778 = vmatprep.subr.bf16.mxu1 %v2629_v55  ;;  %v2715_v55 = vld [vmem:[%s3789_s1 + $0x5e0] ss:$8 sps:$4 sm:$0xff]  }
  0x6f   :  { %1738 = vmatpush2.bf16.msra.mxu0 %v2624_v56  ;;  %v2720_v56 = vld [vmem:[%s3789_s1 + $0x4d4] ss:$8 sps:$4 sm:$0xff]  }
  0x70   :  { %1779 = vmatpush2.bf16.msra.mxu1 %v2627_v57  ;;  %1739 = vmatprep.subr.bf16.mxu0 %v2632_v58  ;;  %v2723_v57 = vld [vmem:[%s3789_s1 + $0x5d4] ss:$8 sps:$4 sm:$0xff]   ;;  %v2718_v58 = vld [vmem:[%s3789_s1 + $0x4d0] ss:$8 sps:$4 sm:$0xff]  }
  0x71   :  { %1780 = vmatprep.subr.bf16.mxu1 %v2635_v59  ;;  %v2721_v59 = vld [vmem:[%s3789_s1 + $0x5d0] ss:$8 sps:$4 sm:$0xff]  }
  0x73   :  { %1740 = vmatpush2.bf16.msra.mxu0 %v2630_v60  ;;  %v2726_v60 = vld [vmem:[%s3789_s1 + $0x4c4] ss:$8 sps:$4 sm:$0xff]  }
  0x74   :  { %1781 = vmatpush2.bf16.msra.mxu1 %v2633_v61  ;;  %1741 = vmatprep.subr.bf16.mxu0 %v2638_v62  ;;  %v2729_v61 = vld [vmem:[%s3789_s1 + $0x5c4] ss:$8 sps:$4 sm:$0xff]   ;;  %v2724_v62 = vld [vmem:[%s3789_s1 + $0x4c0] ss:$8 sps:$4 sm:$0xff]  }
  0x75   :  { %1782 = vmatprep.subr.bf16.mxu1 %v2641_v63  ;;  %v2727_v63 = vld [vmem:[%s3789_s1 + $0x5c0] ss:$8 sps:$4 sm:$0xff]  }
  0x77   :  { %1742 = vmatpush2.bf16.msra.mxu0 %v2636_v0  ;;  %v2732_v0 = vld [vmem:[%s3789_s1 + $0x4b4] ss:$8 sps:$4 sm:$0xff]  }
  0x78   :  { %1783 = vmatpush2.bf16.msra.mxu1 %v2639_v1  ;;  %1743 = vmatprep.subr.bf16.mxu0 %v2644_v2  ;;  %v2735_v1 = vld [vmem:[%s3789_s1 + $0x5b4] ss:$8 sps:$4 sm:$0xff]   ;;  %v2730_v2 = vld [vmem:[%s3789_s1 + $0x4b0] ss:$8 sps:$4 sm:$0xff]  }
  0x79   :  { %1784 = vmatprep.subr.bf16.mxu1 %v2647_v3  ;;  %v2733_v3 = vld [vmem:[%s3789_s1 + $0x5b0] ss:$8 sps:$4 sm:$0xff]  }
  0x7b   :  { %1744 = vmatpush2.bf16.msra.mxu0 %v2642_v4  ;;  %v2738_v4 = vld [vmem:[%s3789_s1 + $0x4a4] ss:$8 sps:$4 sm:$0xff]  }
  0x7c   :  { %1785 = vmatpush2.bf16.msra.mxu1 %v2645_v5  ;;  %1745 = vmatprep.subr.bf16.mxu0 %v2650_v6  ;;  %v2741_v5 = vld [vmem:[%s3789_s1 + $0x5a4] ss:$8 sps:$4 sm:$0xff]   ;;  %v2736_v6 = vld [vmem:[%s3789_s1 + $0x4a0] ss:$8 sps:$4 sm:$0xff]  }
  0x7d   :  { %1786 = vmatprep.subr.bf16.mxu1 %v2653_v7  ;;  %v2739_v7 = vld [vmem:[%s3789_s1 + $0x5a0] ss:$8 sps:$4 sm:$0xff]  }
  0x7f   :  { %1746 = vmatpush2.bf16.msra.mxu0 %v2648_v8  ;;  %v2744_v8 = vld [vmem:[%s3789_s1 + $0x494] ss:$8 sps:$4 sm:$0xff]  }
  0x80   :  { %1787 = vmatpush2.bf16.msra.mxu1 %v2651_v9  ;;  %1797 = vmatprep.subr.bf16.mxu0 %v2660_v10  ;;  %v2747_v9 = vld [vmem:[%s3789_s1 + $0x594] ss:$8 sps:$4 sm:$0xff]   ;;  %v2742_v10 = vld [vmem:[%s3789_s1 + $0x490] ss:$8 sps:$4 sm:$0xff]  }
  0x81   :  { %1838 = vmatprep.subr.bf16.mxu1 %v2663_v11  ;;  %v2745_v11 = vld [vmem:[%s3789_s1 + $0x590] ss:$8 sps:$4 sm:$0xff]  }
  0x82   :  { %1748 = vmatmul.mubr.bf16.vlgmr.msra.gmra.mxu0 %v2151_v12  ;;  %v2750_v12 = vld [vmem:[%s3789_s1 + $0x484] ss:$8 sps:$4 sm:$0xff]  }
  0x83   :  { %1789 = vmatmul.mubr.bf16.vlgmr.msra.gmra.mxu1 %v2153_v13  ;;  %1798 = vmatpush1.bf16.msra.mxu0 %v2658_v14  ;;  %v2753_v13 = vld [vmem:[%s3789_s1 + $0x584] ss:$8 sps:$4 sm:$0xff]   ;;  %v2748_v14 = vld [vmem:[%s3789_s1 + $0x480] ss:$8 sps:$4 sm:$0xff]  }
  0x84   :  { %1839 = vmatpush1.bf16.msra.mxu1 %v2661_v15  ;;  %1799 = vmatprep.subr.bf16.mxu0 %v2666_v16  ;;  %v2751_v15 = vld [vmem:[%s3789_s1 + $0x580] ss:$8 sps:$4 sm:$0xff]   ;;  %v2760_v16 = vld [vmem:[%s3789_s1 + $0x674] ss:$8 sps:$4 sm:$0xff]  }
  0x85   :  { %1840 = vmatprep.subr.bf16.mxu1 %v2669_v17  ;;  %1829 = vmatprep.mubr.bf16.mxu0 %v2156_v20  ;;  %v2763_v17 = vld [vmem:[%s3789_s1 + $0x774] ss:$8 sps:$4 sm:$0xff]   ;;  %v2155_v20 = vcombine.low %v3333_v18, %v3333_v18  ;;  %v2761_v18 = vld [vmem:[%s3789_s1 + $0x770] ss:$8 sps:$4 sm:$0xff]  }
  0x86   :  { %1870 = vmatprep.mubr.bf16.mxu1 %v2158_v21  ;;  %v2157_v21 = vcombine.low %v3338_v19, %v3338_v19  ;;  %v2766_v19 = vld [vmem:[%s3789_s1 + $0x664] ss:$8 sps:$4 sm:$0xff]  }
  0x87   :  { %1800 = vmatpush1.bf16.msra.mxu0 %v2664_v22  ;;  %v3531_v22 = vld [vmem:[%s3790_s0 + $0x30] sm:$0xff] }
  0x88   :  { %1841 = vmatpush1.bf16.msra.mxu1 %v2667_v23  ;;  %1801 = vmatprep.subr.bf16.mxu0 %v2672_v24  ;;  %v3536_v23 = vld [vmem:[%s3790_s0 + $0x38] sm:$0xff] }
  0x89   :  { %1842 = vmatprep.subr.bf16.mxu1 %v2675_v25  ;;  %v2758_v24 = vld [vmem:[%s3789_s1 + $0x670] ss:$8 sps:$4 sm:$0xff]   ;;  %v2769_v25 = vld [vmem:[%s3789_s1 + $0x764] ss:$8 sps:$4 sm:$0xff]  }
  0x8b   :  { %1802 = vmatpush1.bf16.msra.mxu0 %v2670_v26  ;;  %v2160_v26 = vcombine.high %v3531_v22, %v3531_v22 }
  0x8c   :  { %1843 = vmatpush1.bf16.msra.mxu1 %v2673_v27  ;;  %1803 = vmatprep.subr.bf16.mxu0 %v2678_v28  ;;  %v2162_v27 = vcombine.high %v3536_v23, %v3536_v23  ;;  %v2764_v28 = vld [vmem:[%s3789_s1 + $0x660] ss:$8 sps:$4 sm:$0xff]  }
  0x8d   :  { %1844 = vmatprep.subr.bf16.mxu1 %v2681_v29  ;;  %v2767_v29 = vld [vmem:[%s3789_s1 + $0x760] ss:$8 sps:$4 sm:$0xff]  }
  0x8f   :  { %1804 = vmatpush1.bf16.msra.mxu0 %v2676_v30  ;;  %v2772_v30 = vld [vmem:[%s3789_s1 + $0x654] ss:$8 sps:$4 sm:$0xff]  }
  0x90   :  { %1845 = vmatpush1.bf16.msra.mxu1 %v2679_v31  ;;  %1805 = vmatprep.subr.bf16.mxu0 %v2684_v32  ;;  %v2775_v31 = vld [vmem:[%s3789_s1 + $0x754] ss:$8 sps:$4 sm:$0xff]   ;;  %v2770_v32 = vld [vmem:[%s3789_s1 + $0x650] ss:$8 sps:$4 sm:$0xff]  }
  0x91   :  { %1846 = vmatprep.subr.bf16.mxu1 %v2687_v33  ;;  %v2773_v33 = vld [vmem:[%s3789_s1 + $0x750] ss:$8 sps:$4 sm:$0xff]  }
  0x93   :  { %1806 = vmatpush1.bf16.msra.mxu0 %v2682_v34  ;;  %v2778_v34 = vld [vmem:[%s3789_s1 + $0x644] ss:$8 sps:$4 sm:$0xff]  }
  0x94   :  { %1847 = vmatpush1.bf16.msra.mxu1 %v2685_v35  ;;  %1807 = vmatprep.subr.bf16.mxu0 %v2690_v36  ;;  %v2781_v35 = vld [vmem:[%s3789_s1 + $0x744] ss:$8 sps:$4 sm:$0xff]   ;;  %v2776_v36 = vld [vmem:[%s3789_s1 + $0x640] ss:$8 sps:$4 sm:$0xff]  }
  0x95   :  { %1848 = vmatprep.subr.bf16.mxu1 %v2693_v37  ;;  %v2779_v37 = vld [vmem:[%s3789_s1 + $0x740] ss:$8 sps:$4 sm:$0xff]  }
  0x97   :  { %1808 = vmatpush1.bf16.msra.mxu0 %v2688_v38  ;;  %v2784_v38 = vld [vmem:[%s3789_s1 + $0x634] ss:$8 sps:$4 sm:$0xff]  }
  0x98   :  { %1849 = vmatpush1.bf16.msra.mxu1 %v2691_v39  ;;  %1809 = vmatprep.subr.bf16.mxu0 %v2696_v40  ;;  %v2787_v39 = vld [vmem:[%s3789_s1 + $0x734] ss:$8 sps:$4 sm:$0xff]   ;;  %v2782_v40 = vld [vmem:[%s3789_s1 + $0x630] ss:$8 sps:$4 sm:$0xff]  }
  0x99   :  { %1850 = vmatprep.subr.bf16.mxu1 %v2699_v41  ;;  %v2785_v41 = vld [vmem:[%s3789_s1 + $0x730] ss:$8 sps:$4 sm:$0xff]  }
  0x9b   :  { %1810 = vmatpush1.bf16.msra.mxu0 %v2694_v42  ;;  %v2790_v42 = vld [vmem:[%s3789_s1 + $0x624] ss:$8 sps:$4 sm:$0xff]  }
  0x9c   :  { %1851 = vmatpush1.bf16.msra.mxu1 %v2697_v43  ;;  %1811 = vmatprep.subr.bf16.mxu0 %v2702_v44  ;;  %v2793_v43 = vld [vmem:[%s3789_s1 + $0x724] ss:$8 sps:$4 sm:$0xff]   ;;  %v2788_v44 = vld [vmem:[%s3789_s1 + $0x620] ss:$8 sps:$4 sm:$0xff]  }
  0x9d   :  { %1852 = vmatprep.subr.bf16.mxu1 %v2705_v45  ;;  %v2791_v45 = vld [vmem:[%s3789_s1 + $0x720] ss:$8 sps:$4 sm:$0xff]  }
  0x9f   :  { %1812 = vmatpush1.bf16.msra.mxu0 %v2700_v46  ;;  %v2796_v46 = vld [vmem:[%s3789_s1 + $0x614] ss:$8 sps:$4 sm:$0xff]  }
  0xa0   :  { %1853 = vmatpush1.bf16.msra.mxu1 %v2703_v47  ;;  %1813 = vmatprep.subr.bf16.mxu0 %v2708_v48  ;;  %v2799_v47 = vld [vmem:[%s3789_s1 + $0x714] ss:$8 sps:$4 sm:$0xff]   ;;  %v2794_v48 = vld [vmem:[%s3789_s1 + $0x610] ss:$8 sps:$4 sm:$0xff]  }
  0xa1   :  { %1854 = vmatprep.subr.bf16.mxu1 %v2711_v49  ;;  %v2797_v49 = vld [vmem:[%s3789_s1 + $0x710] ss:$8 sps:$4 sm:$0xff]  }
  0xa3   :  { %1814 = vmatpush2.bf16.msra.mxu0 %v2706_v50  ;;  %v2802_v50 = vld [vmem:[%s3789_s1 + $0x604] ss:$8 sps:$4 sm:$0xff]  }
  0xa4   :  { %1855 = vmatpush2.bf16.msra.mxu1 %v2709_v51  ;;  %1815 = vmatprep.subr.bf16.mxu0 %v2714_v52  ;;  %v2805_v51 = vld [vmem:[%s3789_s1 + $0x704] ss:$8 sps:$4 sm:$0xff]   ;;  %v2800_v52 = vld [vmem:[%s3789_s1 + $0x600] ss:$8 sps:$4 sm:$0xff]  }
  0xa5   :  { %1856 = vmatprep.subr.bf16.mxu1 %v2717_v53  ;;  %v2803_v53 = vld [vmem:[%s3789_s1 + $0x700] ss:$8 sps:$4 sm:$0xff]  }
  0xa7   :  { %1816 = vmatpush2.bf16.msra.mxu0 %v2712_v54  ;;  %v2808_v54 = vld [vmem:[%s3789_s1 + $0x6f4] ss:$8 sps:$4 sm:$0xff]  }
  0xa8   :  { %1857 = vmatpush2.bf16.msra.mxu1 %v2715_v55  ;;  %1817 = vmatprep.subr.bf16.mxu0 %v2720_v56  ;;  %v2811_v55 = vld [vmem:[%s3789_s1 + $0x7f4] ss:$8 sps:$4 sm:$0xff]   ;;  %v2806_v56 = vld [vmem:[%s3789_s1 + $0x6f0] ss:$8 sps:$4 sm:$0xff]  }
  0xa9   :  { %1858 = vmatprep.subr.bf16.mxu1 %v2723_v57  ;;  %v2809_v57 = vld [vmem:[%s3789_s1 + $0x7f0] ss:$8 sps:$4 sm:$0xff]  }
  0xab   :  { %1818 = vmatpush2.bf16.msra.mxu0 %v2718_v58  ;;  %v2814_v58 = vld [vmem:[%s3789_s1 + $0x6e4] ss:$8 sps:$4 sm:$0xff]  }
  0xac   :  { %1859 = vmatpush2.bf16.msra.mxu1 %v2721_v59  ;;  %1819 = vmatprep.subr.bf16.mxu0 %v2726_v60  ;;  %v2817_v59 = vld [vmem:[%s3789_s1 + $0x7e4] ss:$8 sps:$4 sm:$0xff]   ;;  %v2812_v60 = vld [vmem:[%s3789_s1 + $0x6e0] ss:$8 sps:$4 sm:$0xff]  }
  0xad   :  { %1860 = vmatprep.subr.bf16.mxu1 %v2729_v61  ;;  %v2815_v61 = vld [vmem:[%s3789_s1 + $0x7e0] ss:$8 sps:$4 sm:$0xff]  }
  0xaf   :  { %1820 = vmatpush2.bf16.msra.mxu0 %v2724_v62  ;;  %v2820_v62 = vld [vmem:[%s3789_s1 + $0x6d4] ss:$8 sps:$4 sm:$0xff]  }
  0xb0   :  { %1861 = vmatpush2.bf16.msra.mxu1 %v2727_v63  ;;  %1821 = vmatprep.subr.bf16.mxu0 %v2732_v0  ;;  %v2823_v63 = vld [vmem:[%s3789_s1 + $0x7d4] ss:$8 sps:$4 sm:$0xff]   ;;  %v2818_v0 = vld [vmem:[%s3789_s1 + $0x6d0] ss:$8 sps:$4 sm:$0xff]  }
  0xb1   :  { %1862 = vmatprep.subr.bf16.mxu1 %v2735_v1  ;;  %v2821_v1 = vld [vmem:[%s3789_s1 + $0x7d0] ss:$8 sps:$4 sm:$0xff]  }
  0xb3   :  { %1822 = vmatpush2.bf16.msra.mxu0 %v2730_v2  ;;  %v2826_v2 = vld [vmem:[%s3789_s1 + $0x6c4] ss:$8 sps:$4 sm:$0xff]  }
  0xb4   :  { %1863 = vmatpush2.bf16.msra.mxu1 %v2733_v3  ;;  %1823 = vmatprep.subr.bf16.mxu0 %v2738_v4  ;;  %v2829_v3 = vld [vmem:[%s3789_s1 + $0x7c4] ss:$8 sps:$4 sm:$0xff]   ;;  %v2824_v4 = vld [vmem:[%s3789_s1 + $0x6c0] ss:$8 sps:$4 sm:$0xff]  }
  0xb5   :  { %1864 = vmatprep.subr.bf16.mxu1 %v2741_v5  ;;  %v2827_v5 = vld [vmem:[%s3789_s1 + $0x7c0] ss:$8 sps:$4 sm:$0xff]  }
  0xb7   :  { %1824 = vmatpush2.bf16.msra.mxu0 %v2736_v6  ;;  %v2832_v6 = vld [vmem:[%s3789_s1 + $0x6b4] ss:$8 sps:$4 sm:$0xff]  }
  0xb8   :  { %1865 = vmatpush2.bf16.msra.mxu1 %v2739_v7  ;;  %1825 = vmatprep.subr.bf16.mxu0 %v2744_v8  ;;  %v2835_v7 = vld [vmem:[%s3789_s1 + $0x7b4] ss:$8 sps:$4 sm:$0xff]   ;;  %v2830_v8 = vld [vmem:[%s3789_s1 + $0x6b0] ss:$8 sps:$4 sm:$0xff]  }
  0xb9   :  { %1866 = vmatprep.subr.bf16.mxu1 %v2747_v9  ;;  %v2833_v9 = vld [vmem:[%s3789_s1 + $0x7b0] ss:$8 sps:$4 sm:$0xff]  }
  0xbb   :  { %1826 = vmatpush2.bf16.msra.mxu0 %v2742_v10  ;;  %v2838_v10 = vld [vmem:[%s3789_s1 + $0x6a4] ss:$8 sps:$4 sm:$0xff]  }
  0xbc   :  { %1867 = vmatpush2.bf16.msra.mxu1 %v2745_v11  ;;  %1827 = vmatprep.subr.bf16.mxu0 %v2750_v12  ;;  %v2841_v11 = vld [vmem:[%s3789_s1 + $0x7a4] ss:$8 sps:$4 sm:$0xff]   ;;  %v2836_v12 = vld [vmem:[%s3789_s1 + $0x6a0] ss:$8 sps:$4 sm:$0xff]  }
  0xbd   :  { %1868 = vmatprep.subr.bf16.mxu1 %v2753_v13  ;;  %v2839_v13 = vld [vmem:[%s3789_s1 + $0x7a0] ss:$8 sps:$4 sm:$0xff]  }
  0xbf   :  { %1828 = vmatpush2.bf16.msra.mxu0 %v2748_v14  ;;  %v287_v14 = vlaneseq }
  0xc0   :  { %1869 = vmatpush2.bf16.msra.mxu1 %v2751_v15  ;;  %1879 = vmatprep.subr.bf16.mxu0 %v2760_v16  ;;  %v2844_v15 = vld [vmem:[%s3789_s1 + $0x694] ss:$8 sps:$4 sm:$0xff]  }
  0xc1   :  { %1920 = vmatprep.subr.bf16.mxu1 %v2763_v17  ;;  %v2847_v16 = vld [vmem:[%s3789_s1 + $0x794] ss:$8 sps:$4 sm:$0xff]   ;;  %v2842_v17 = vld [vmem:[%s3789_s1 + $0x690] ss:$8 sps:$4 sm:$0xff]  }
  0xc2   :  { %1830 = vmatmul.mubr.bf16.vlgmr.msra.gmra.mxu0 %v2155_v20  ;;  %v2845_v20 = vld [vmem:[%s3789_s1 + $0x790] ss:$8 sps:$4 sm:$0xff]  }
  0xc3   :  { %1871 = vmatmul.mubr.bf16.vlgmr.msra.gmra.mxu1 %v2157_v21  ;;  %1880 = vmatpush1.bf16.msra.mxu0 %v2758_v24  ;;  %v288_v21 = vshrl.u32 %v287_v14, 7  ;;  %v2850_v24 = vld [vmem:[%s3789_s1 + $0x684] ss:$8 sps:$4 sm:$0xff]  }
  0xc4   :  { %1921 = vmatpush1.bf16.msra.mxu1 %v2761_v18  ;;  %1881 = vmatprep.subr.bf16.mxu0 %v2766_v19  ;;  %v2853_v18 = vld [vmem:[%s3789_s1 + $0x784] ss:$8 sps:$4 sm:$0xff]   ;;  %v2848_v19 = vld [vmem:[%s3789_s1 + $0x680] ss:$8 sps:$4 sm:$0xff]  }
  0xc5   :  { %1922 = vmatprep.subr.bf16.mxu1 %v2769_v25  ;;  %1911 = vmatprep.mubr.bf16.mxu0 %v2160_v26  ;;  %v2851_v25 = vld [vmem:[%s3789_s1 + $0x780] ss:$8 sps:$4 sm:$0xff]   ;;  %v289_v26 = vsub.s32 0, %v288_v21 }
  0xc6   :  { %1952 = vmatprep.mubr.bf16.mxu1 %v2162_v27  ;;  %v285_v27 = vld [vmem:[%s3791_s2] sm:$0x3] }
  0xc7   :  { %1882 = vmatpush1.bf16.msra.mxu0 %v2764_v28  ;;  %v293_v28 = vsub.s32 1, %v288_v21 }
  0xc8   :  { %1923 = vmatpush1.bf16.msra.mxu1 %v2767_v29  ;;  %1883 = vmatprep.subr.bf16.mxu0 %v2772_v30  ;;  %v2159_v29 = vcombine.low %v3531_v22, %v3531_v22  ;;  %v2161_v30 = vcombine.low %v3536_v23, %v3536_v23  ;;  %v2858_v23 = vld [vmem:[%s3792_s3 + $0x78] sm:$0xff]  }
  0xc9   :  { %1924 = vmatprep.subr.bf16.mxu1 %v2775_v31  ;;  %v290_v31 = vrot.slane %v285_v27, %v289_v26 }
  0xcb   :  { %1884 = vmatpush1.bf16.msra.mxu0 %v2770_v32  ;;  %v294_v32 = vrot.slane %v285_v27, %v293_v28 }
  0xcc   :  { %1925 = vmatpush1.bf16.msra.mxu1 %v2773_v33  ;;  %1885 = vmatprep.subr.bf16.mxu0 %v2778_v34 }
  0xcd   :  { %1926 = vmatprep.subr.bf16.mxu1 %v2781_v35 }
  0xcf   :  { %1886 = vmatpush1.bf16.msra.mxu0 %v2776_v36 }
  0xd0   :  { %1927 = vmatpush1.bf16.msra.mxu1 %v2779_v37  ;;  %1887 = vmatprep.subr.bf16.mxu0 %v2784_v38 }
  0xd1   :  { %1928 = vmatprep.subr.bf16.mxu1 %v2787_v39 }
  0xd3   :  { %1888 = vmatpush1.bf16.msra.mxu0 %v2782_v40 }
  0xd4   :  { %1929 = vmatpush1.bf16.msra.mxu1 %v2785_v41  ;;  %1889 = vmatprep.subr.bf16.mxu0 %v2790_v42 }
  0xd5   :  { %1930 = vmatprep.subr.bf16.mxu1 %v2793_v43 }
  0xd7   :  { %1890 = vmatpush1.bf16.msra.mxu0 %v2788_v44  ;;  %v2859_v44 = vld [vmem:[%s3792_s3 + $0x38] sm:$0xff]  }
  0xd8   :  { %1931 = vmatpush1.bf16.msra.mxu1 %v2791_v45  ;;  %1891 = vmatprep.subr.bf16.mxu0 %v2796_v46  ;;  %v2860_v45 = vld [vmem:[%s3792_s3 + $0x70] sm:$0xff]  }
  0xd9   :  { %1932 = vmatprep.subr.bf16.mxu1 %v2799_v47  ;;  %v2861_v46 = vld [vmem:[%s3792_s3 + $0x30] sm:$0xff]   ;;  %v2862_v47 = vld [vmem:[%s3792_s3 + $0x68] sm:$0xff]  }
  0xdb   :  { %1892 = vmatpush1.bf16.msra.mxu0 %v2794_v48  ;;  %v2863_v48 = vld [vmem:[%s3792_s3 + $0x28] sm:$0xff]  }
  0xdc   :  { %1933 = vmatpush1.bf16.msra.mxu1 %v2797_v49  ;;  %1893 = vmatprep.subr.bf16.mxu0 %v2802_v50  ;;  %v2864_v49 = vld [vmem:[%s3792_s3 + $0x60] sm:$0xff]  }
  0xdd   :  { %1934 = vmatprep.subr.bf16.mxu1 %v2805_v51  ;;  %v2865_v50 = vld [vmem:[%s3792_s3 + $0x20] sm:$0xff]   ;;  %v2866_v51 = vld [vmem:[%s3792_s3 + $0x58] sm:$0xff]  }
  0xdf   :  { %1894 = vmatpush1.bf16.msra.mxu0 %v2800_v52  ;;  %v2867_v52 = vld [vmem:[%s3792_s3 + $0x18] sm:$0xff]  }
  0xe0   :  { %1935 = vmatpush1.bf16.msra.mxu1 %v2803_v53  ;;  %1895 = vmatprep.subr.bf16.mxu0 %v2808_v54 }
  0xe1   :  { %1936 = vmatprep.subr.bf16.mxu1 %v2811_v55  ;;  %v2868_v55 = vld [vmem:[%s3792_s3 + $0x50] sm:$0xff]  }
  0xe3   :  { %1896 = vmatpush2.bf16.msra.mxu0 %v2806_v56 }
  0xe4   :  { %1937 = vmatpush2.bf16.msra.mxu1 %v2809_v57  ;;  %1897 = vmatprep.subr.bf16.mxu0 %v2814_v58  ;;  %v2869_v57 = vld [vmem:[%s3792_s3 + $0x10] sm:$0xff]  }
  0xe5   :  { %1938 = vmatprep.subr.bf16.mxu1 %v2817_v59 }
  0xe7   :  { %1898 = vmatpush2.bf16.msra.mxu0 %v2812_v60 }
  0xe8   :  { %1939 = vmatpush2.bf16.msra.mxu1 %v2815_v61  ;;  %1899 = vmatprep.subr.bf16.mxu0 %v2820_v62 }
  0xe9   :  { %1940 = vmatprep.subr.bf16.mxu1 %v2823_v63 }
  0xeb   :  { %1900 = vmatpush2.bf16.msra.mxu0 %v2818_v0  ;;  %v2870_v0 = vld [vmem:[%s3792_s3 + $0x48] sm:$0xff]  }
  0xec   :  { %1941 = vmatpush2.bf16.msra.mxu1 %v2821_v1  ;;  %1901 = vmatprep.subr.bf16.mxu0 %v2826_v2  ;;  %v2871_v2 = vld [vmem:[%s3792_s3 + $0x8] sm:$0xff]  }
  0xed   :  { %1942 = vmatprep.subr.bf16.mxu1 %v2829_v3 }
  0xef   :  { %1902 = vmatpush2.bf16.msra.mxu0 %v2824_v4 }
  0xf0   :  { %1943 = vmatpush2.bf16.msra.mxu1 %v2827_v5  ;;  %1903 = vmatprep.subr.bf16.mxu0 %v2832_v6  ;;  %v2872_v5 = vld [vmem:[%s3792_s3 + $0x40] sm:$0xff]  }
  0xf1   :  { %1944 = vmatprep.subr.bf16.mxu1 %v2835_v7  ;;  %v2873_v6 = vld [vmem:[%s3792_s3] sm:$0xff]  }
  0xf3   :  { %1904 = vmatpush2.bf16.msra.mxu0 %v2830_v8 }
  0xf4   :  { %1945 = vmatpush2.bf16.msra.mxu1 %v2833_v9  ;;  %1905 = vmatprep.subr.bf16.mxu0 %v2838_v10 }
  0xf5   :  { %1946 = vmatprep.subr.bf16.mxu1 %v2841_v11 }
  0xf7   :  { %1906 = vmatpush2.bf16.msra.mxu0 %v2836_v12 }
  0xf8   :  { %1947 = vmatpush2.bf16.msra.mxu1 %v2839_v13  ;;  %1907 = vmatprep.subr.bf16.mxu0 %v2844_v15 }
  0xf9   :  { %1948 = vmatprep.subr.bf16.mxu1 %v2847_v16 }
  0xfb   :  { %1908 = vmatpush2.bf16.msra.mxu0 %v2842_v17 }
  0xfc   :  { %1949 = vmatpush2.bf16.msra.mxu1 %v2845_v20  ;;  %1909 = vmatprep.subr.bf16.mxu0 %v2850_v24 }
  0xfd   :  { %1950 = vmatprep.subr.bf16.mxu1 %v2853_v18 }
  0xff   :  { %1910 = vmatpush2.bf16.msra.mxu0 %v2848_v19 }
 0x100   :  { %1951 = vmatpush2.bf16.msra.mxu1 %v2851_v25  ;;  %2436 = vmatprep.subr.bf16.mxu0 %v2858_v23 }
 0x102   :  { %v1667_v33 = vpop.f32.mrf.mxu0  ;;  %1912 = vmatmul.mubr.bf16.vlgmr.msra.gmra.mxu0 %v2159_v29 }
 0x103   :  { %v1708_v34 = vpop.f32.mrf.mxu1  ;;  %1953 = vmatmul.mubr.bf16.vlgmr.msra.gmra.mxu1 %v2161_v30  ;;  %v1668_v35 = vadd.f32 %v1667_v33, %v290_v31  ;;  %2437 = vmatpush3.bf16.msra.mxu0 %v2859_v44 }
 0x104   :  { %v1669_v36 = vpop.f32.mrf.mxu0  ;;  %2438 = vmatprep.subr.bf16.mxu0 %v2860_v45 }
 0x105   :  { %v1710_v37 = vpop.f32.mrf.mxu1  ;;  %v1709_v38 = vadd.f32 %v1708_v34, %v1668_v35  ;;  %v1670_v39 = vadd.f32 %v1669_v36, %v294_v32 }
 0x106   :  { %v1671_v40 = vpop.f32.mrf.mxu0 }
 0x107   :  { %v1712_v41 = vpop.f32.mrf.mxu1  ;;  %v1711_v42 = vadd.f32 %v1710_v37, %v1670_v39  ;;  %2439 = vmatpush3.bf16.msra.mxu0 %v2861_v46  ;;  %v2419_v40 = vld [vmem:[%s3793_s4] ss:$0 sm:$0xff] }
 0x108   :  { %v1672_v22 = vpop.f32.mrf.mxu0  ;;  %2440 = vmatprep.subr.bf16.mxu0 %v2862_v47 }
 0x109   :  { %v1713_v43 = vpop.f32.mrf.mxu1 }
 0x10b   :  { %2441 = vmatpush3.bf16.msra.mxu0 %v2863_v48 }
 0x10c   :  { %2442 = vmatprep.subr.bf16.mxu0 %v2864_v49 }
 0x10f   :  { %2443 = vmatpush3.bf16.msra.mxu0 %v2865_v50 }
 0x110   :  { %2444 = vmatprep.subr.bf16.mxu0 %v2866_v51 }
 0x113   :  { %2445 = vmatpush3.bf16.msra.mxu0 %v2867_v52 }
 0x114   :  { %2446 = vmatprep.subr.bf16.mxu0 %v2868_v55 }
 0x117   :  { %2447 = vmatpush3.bf16.msra.mxu0 %v2869_v57 }
 0x118   :  { %2448 = vmatprep.subr.bf16.mxu0 %v2870_v0 }
 0x11b   :  { %2449 = vmatpush3.bf16.msra.mxu0 %v2871_v2 }
 0x11c   :  { %2450 = vmatprep.subr.bf16.mxu0 %v2872_v5 }
 0x11f   :  { %2451 = vmatpush3.bf16.msra.mxu0 %v2873_v6 }
 0x142   :  { %v1749_v53 = vpop.f32.mrf.mxu0 }
 0x143   :  { %v1790_v54 = vpop.f32.mrf.mxu1  ;;  %v1750_v56 = vadd.f32 %v1749_v53, %v1709_v38 }
 0x144   :  { %v1751_v58 = vpop.f32.mrf.mxu0 }
 0x145   :  { %v1792_v59 = vpop.f32.mrf.mxu1  ;;  %v1791_v60 = vadd.f32 %v1790_v54, %v1750_v56  ;;  %v1752_v61 = vadd.f32 %v1751_v58, %v1711_v42 }
 0x146   :  { %v1753_v62 = vpop.f32.mrf.mxu0 }
 0x147   :  { %v1794_v63 = vpop.f32.mrf.mxu1  ;;  %v1793_v1 = vadd.f32 %v1792_v59, %v1752_v61 }
 0x148   :  { %v1754_v3 = vpop.f32.mrf.mxu0 }
 0x149   :  { %v1795_v4 = vpop.f32.mrf.mxu1 }
 0x182   :  { %v1831_v7 = vpop.f32.mrf.mxu0 }
 0x183   :  { %v1872_v8 = vpop.f32.mrf.mxu1  ;;  %v1832_v9 = vadd.f32 %v1831_v7, %v1791_v60 }
 0x184   :  { %v1833_v10 = vpop.f32.mrf.mxu0 }
 0x185   :  { %v1874_v11 = vpop.f32.mrf.mxu1  ;;  %v1873_v12 = vadd.f32 %v1872_v8, %v1832_v9  ;;  %v1834_v17 = vadd.f32 %v1833_v10, %v1793_v1 }
 0x186   :  { %v1835_v13 = vpop.f32.mrf.mxu0 }
 0x187   :  { %v1876_v14 = vpop.f32.mrf.mxu1  ;;  %v1875_v24 = vadd.f32 %v1874_v11, %v1834_v17 }
 0x188   :  { %v1836_v15 = vpop.f32.mrf.mxu0 }
 0x189   :  { %v1877_v16 = vpop.f32.mrf.mxu1 }
 0x1c2   :  { %v1913_v20 = vpop.f32.mrf.mxu0 }
 0x1c3   :  { %v1954_v21 = vpop.f32.mrf.mxu1  ;;  %v1914_v18 = vadd.f32 %v1913_v20, %v1873_v12 }
 0x1c4   :  { %v1915_v19 = vpop.f32.mrf.mxu0 }
 0x1c5   :  { %v1956_v25 = vpop.f32.mrf.mxu1  ;;  %v1955_v26 = vadd.f32 %v1954_v21, %v1914_v18  ;;  %v1916_v27 = vadd.f32 %v1915_v19, %v1875_v24 }
 0x1c6   :  { %v1917_v28 = vpop.f32.mrf.mxu0 }
 0x1c7   :  { %v1958_v29 = vpop.f32.mrf.mxu1  ;;  %v1961_v30 = vmul.f32 0.2, %v1955_v26  ;;  %v1957_v31 = vadd.f32 %v1956_v25, %v1916_v27 }
 0x1c8   :  { %v1918_v32 = vpop.f32.mrf.mxu0 }
 0x1c9   :  { %v1959_v33 = vpop.f32.mrf.mxu1  ;;  %v1962_v34 = vmul.f32 0.2, %v1957_v31  ;;  %v1963_v35 = vmax.f32 %v1955_v26, %v1961_v30 }
 0x1cb   :  { %v1964_v36 = vmax.f32 %v1957_v31, %v1962_v34  ;;  %v1965_v38 = vpack.c.bf16 %v1963_v35, %v1963_v35 }
 0x1cd   :  { %v1966_v37 = vpack.c.bf16 %v1964_v36, %v1964_v36 }
 0x1cf   :  { %2134 = vmatprep.mubr.bf16.mxu0 %v1966_v37 }
 0x1d0   :  { %2135 = vmatmul.mubr.bf16.vlgmr.msra.gmra.mxu0 %v1965_v38 }
 0x290   :  { %v2452_v39 = vpop.f32.mrf.mxu0 }
 0x292   :  { %v2453_v41 = vpop.f32.mrf.mxu0 }
 0x293   :  { %v2454_v42 = vadd.f32 %v2453_v41, %v2452_v39 }
 0x294   :  { %v2455_v22 = vpop.f32.mrf.mxu0 }
 0x295   :  { %v2137_v43 = vadd.f32 %v2454_v42, %v2419_v40 }
 0x296   :  { %v2456_v23 = vpop.f32.mrf.mxu0 }
 0x297   :  { %2142 = vst [vmem:[%s3794_s5] sm:$0xff] %v2137_v43 }

</bundles_post_ra>
